<compile_context>
chip_gen: v6e
topology: v6e:2x2x1
jax: 0.10.0
libtpu: 0.0.40
codegen_flags: <defaults>
</compile_context>

<pallas_src>
import math

import jax
import jax.numpy as jnp
from jax import lax
from jax.experimental import pallas as pl
from jax.experimental.pallas import tpu as pltpu  # noqa: F401  (TPU backend)

D_MODEL = 32
N_HEADS = 4
D_K = D_MODEL // N_HEADS
D_FF = 64
EPS = 1e-6
NEG_INF = -1e9


# ---------------------------------------------------------------------------
# Pallas kernel: whole decoder layer, whole batch, fused in one invocation.
# ---------------------------------------------------------------------------
def decoder_layer_kernel(x_ref, mem_ref, sbias_ref, cbias_ref,
                         wqkv_s_ref, bqkv_s_ref, wo_s_ref, bo_s_ref,
                         wq_c_ref, bq_c_ref, wkv_c_ref, bkv_c_ref,
                         wo_c_ref, bo_c_ref,
                         w1_ref, b1_ref, w2_ref, b2_ref,
                         lng_ref, lnb_ref, o_ref):
    x = x_ref[...]        # (B*T, D)  batch folded into rows
    mem = mem_ref[...]    # (B*S, D)
    lng = lng_ref[...]    # (3, D)
    lnb = lnb_ref[...]    # (3, D)

    def layer_norm(v, i):
        # Annotated-transformer LayerNorm: g*(x-mean)/(std+eps)+b, unbiased std.
        g = lng[i:i + 1, :]
        b = lnb[i:i + 1, :]
        mean = jnp.mean(v, axis=-1, keepdims=True)
        var = jnp.sum((v - mean) ** 2, axis=-1, keepdims=True) / (v.shape[-1] - 1)
        return g * (v - mean) / (jnp.sqrt(var) + EPS) + b

    def attention(q, k, v, bias, wo, bo):
        # q: (R, D) already scale-folded; k, v: (C, D); bias: (R, C) additive
        # (0 = attend, -1e9 = masked / other batch); wo: (D, D); bo: (1, D).
        acc = None
        for h in range(N_HEADS):  # static unroll over heads
            sl = slice(h * D_K, (h + 1) * D_K)
            qh, kh, vh = q[:, sl], k[:, sl], v[:, sl]
            # scores over ALL batches' keys at once; cross-batch entries are
            # killed by the additive bias (NT dot_general, no explicit .T).
            s = lax.dot_general(qh, kh, (((1,), (1,)), ((), ())),
                                preferred_element_type=jnp.float32) + bias
            m = jnp.max(s, axis=-1, keepdims=True)
            p = jnp.exp(s - m)
            denom = jnp.sum(p, axis=-1, keepdims=True)
            p = p * pl.reciprocal(denom, approx=True)          # EUP slot
            ctx = jnp.dot(p, vh, preferred_element_type=jnp.float32)   # (R, Dk)
            # Partial output projection per head (== concat(heads) @ Wo).
            part = jnp.dot(ctx, wo[sl, :], preferred_element_type=jnp.float32)
            acc = part if acc is None else acc + part
        return acc + bo

    # --- sublayer 0: masked multi-head self-attention ---
    xn = layer_norm(x, 0)
    qkv = jnp.dot(xn, wqkv_s_ref[...],
                  preferred_element_type=jnp.float32) + bqkv_s_ref[...]  # (B*T, 3D)
    q = qkv[:, :D_MODEL]
    k = qkv[:, D_MODEL:2 * D_MODEL]
    v = qkv[:, 2 * D_MODEL:]
    x = x + attention(q, k, v, sbias_ref[...], wo_s_ref[...], bo_s_ref[...])

    # --- sublayer 1: cross-attention over encoder memory ---
    xn = layer_norm(x, 1)
    q = jnp.dot(xn, wq_c_ref[...],
                preferred_element_type=jnp.float32) + bq_c_ref[...]       # (B*T, D)
    kv = jnp.dot(mem, wkv_c_ref[...],
                 preferred_element_type=jnp.float32) + bkv_c_ref[...]     # (B*S, 2D)
    k = kv[:, :D_MODEL]
    v = kv[:, D_MODEL:]
    x = x + attention(q, k, v, cbias_ref[...], wo_c_ref[...], bo_c_ref[...])

    # --- sublayer 2: position-wise feed-forward ---
    xn = layer_norm(x, 2)
    h = jnp.maximum(
        jnp.dot(xn, w1_ref[...], preferred_element_type=jnp.float32) + b1_ref[...],
        0.0)
    x = x + jnp.dot(h, w2_ref[...], preferred_element_type=jnp.float32) + b2_ref[...]

    o_ref[...] = x.astype(o_ref.dtype)


# ---------------------------------------------------------------------------
# Wrapper: weight packing, scale folding, mask -> additive block-diag bias.
# ---------------------------------------------------------------------------
def _pack_params(params):
    saw, sab, caw, cab, w1, b1, w2, b2, lng, lnb = params
    scale = 1.0 / math.sqrt(D_K)
    # Self-attn: fused [Wq*scale | Wk | Wv]  (one (D,3D) matmul in-kernel).
    wqkv_s = jnp.concatenate([saw[0] * scale, saw[1], saw[2]], axis=1)       # (D, 3D)
    bqkv_s = jnp.concatenate([sab[0] * scale, sab[1], sab[2]], axis=0)[None, :]
    wo_s, bo_s = saw[3], sab[3][None, :]
    # Cross-attn: Wq*scale, fused [Wk | Wv].
    wq_c, bq_c = caw[0] * scale, (cab[0] * scale)[None, :]
    wkv_c = jnp.concatenate([caw[1], caw[2]], axis=1)                        # (D, 2D)
    bkv_c = jnp.concatenate([cab[1], cab[2]], axis=0)[None, :]
    wo_c, bo_c = caw[3], cab[3][None, :]
    return (wqkv_s, bqkv_s, wo_s, bo_s, wq_c, bq_c, wkv_c, bkv_c, wo_c, bo_c,
            w1, b1.reshape(1, D_FF), w2, b2.reshape(1, D_MODEL), lng, lnb)


def _additive_block_bias(mask):
    """mask: (B, R, C), >0 == attend -> (B*R, B*C) additive 0/-1e9 bias that
    also masks cross-batch entries (block-diagonal batch structure)."""
    B, R, C = mask.shape
    keep = mask > 0
    same_batch = jnp.eye(B, dtype=bool)[:, None, :, None]        # (B,1,B,1)
    full = jnp.logical_and(keep[:, :, None, :], same_batch)      # (B,R,B,C)
    return jnp.where(full, 0.0, NEG_INF).astype(jnp.float32).reshape(B * R, B * C)


@jax.jit
def decoder_layer(x, memory, src_mask, tgt_mask, params):
    B, T, D = x.shape
    S = memory.shape[1]
    packed = _pack_params(params)
    sbias = _additive_block_bias(tgt_mask)    # (B*T, B*T)
    cbias = _additive_block_bias(src_mask)    # (B*T, B*S)
    xf = x.reshape(B * T, D)                  # fold batch into rows (free in XLA)
    mf = memory.reshape(B * S, D)

    out = pl.pallas_call(
        decoder_layer_kernel,
        out_shape=jax.ShapeDtypeStruct((B * T, D), jnp.float32),
    )(xf, mf, sbias, cbias, *packed)
    return out.reshape(B, T, D)


# ---------------------------------------------------------------------------
# Pure-JAX reference (original unpacked per-head / per-batch math).
# ---------------------------------------------------------------------------
def _layer_norm_ref(x, g, b):
    mean = jnp.mean(x, axis=-1, keepdims=True)
    var = jnp.sum((x - mean) ** 2, axis=-1, keepdims=True) / (x.shape[-1] - 1)
    return g * (x - mean) / (jnp.sqrt(var) + EPS) + b


def _mha_ref(q_in, kv_in, mask, w, b):
    q = q_in @ w[0] + b[0]
    k = kv_in @ w[1] + b[1]
    v = kv_in @ w[2] + b[2]
    scale = 1.0 / math.sqrt(D_K)
    heads = []
    for h in range(N_HEADS):
        sl = slice(h * D_K, (h + 1) * D_K)
        scores = (q[:, sl] @ k[:, sl].T) * scale
        scores = jnp.where(mask > 0, scores, NEG_INF)
        p = jax.nn.softmax(scores, axis=-1)
        heads.append(p @ v[:, sl])
    return jnp.concatenate(heads, axis=-1) @ w[3] + b[3]


def reference(x, memory, src_mask, tgt_mask, params):
    saw, sab, caw, cab, w1, b1, w2, b2, lng, lnb = params

    def one(xb, mb, sm, tm):
        xn = _layer_norm_ref(xb, lng[0], lnb[0]); xb = xb + _mha_ref(xn, xn, tm, saw, sab)
        xn = _layer_norm_ref(xb, lng[1], lnb[1]); xb = xb + _mha_ref(xn, mb, sm, caw, cab)
        xn = _layer_norm_ref(xb, lng[2], lnb[2])
        h = jnp.maximum(xn @ w1 + b1, 0.0)
        return xb + h @ w2 + b2

    return jax.vmap(one)(x, memory, src_mask, tgt_mask)


if __name__ == "__main__":
    B, T, S = 2, 8, 16
    key = jax.random.PRNGKey(0)
    ks = jax.random.split(key, 12)

    # Deterministic synthetic parameters (no checkpoint).
    saw = 0.1 * jax.random.normal(ks[0], (4, D_MODEL, D_MODEL), jnp.float32)  # self-attn Wq,Wk,Wv,Wo
    sab = 0.1 * jax.random.normal(ks[1], (4, D_MODEL), jnp.float32)
    caw = 0.1 * jax.random.normal(ks[2], (4, D_MODEL, D_MODEL), jnp.float32)  # src-attn Wq,Wk,Wv,Wo
    cab = 0.1 * jax.random.normal(ks[3], (4, D_MODEL), jnp.float32)
    w1 = 0.1 * jax.random.normal(ks[4], (D_MODEL, D_FF), jnp.float32)
    b1 = 0.1 * jax.random.normal(ks[5], (1, D_FF), jnp.float32)
    w2 = 0.1 * jax.random.normal(ks[6], (D_FF, D_MODEL), jnp.float32)
    b2 = 0.1 * jax.random.normal(ks[7], (1, D_MODEL), jnp.float32)
    lng = jnp.ones((3, D_MODEL), jnp.float32)    # LayerNorm a_2 (x3 sublayers)
    lnb = jnp.zeros((3, D_MODEL), jnp.float32)   # LayerNorm b_2 (x3 sublayers)
    params = (saw, sab, caw, cab, w1, b1, w2, b2, lng, lnb)

    x = jax.random.normal(ks[8], (B, T, D_MODEL), jnp.float32)
    memory = jax.random.normal(ks[9], (B, S, D_MODEL), jnp.float32)

    # Masks: >0 means "attend". Causal mask for self-attn; src mask hides the
    # last 3 encoder positions.
    tgt_mask = jnp.broadcast_to(jnp.tril(jnp.ones((T, T), jnp.float32)), (B, T, T))
    src_mask = jnp.ones((B, T, S), jnp.float32).at[:, :, S - 3:].set(0.0)

    out = decoder_layer(x, memory, src_mask, tgt_mask, params)
    out = jax.block_until_ready(out)

    ref = reference(x, memory, src_mask, tgt_mask, params)
    assert out.shape == (B, T, D_MODEL)
    # Tolerance is loosened from 1e-4 solely because the kernel uses the EUP
    # approximate reciprocal for the softmax denominator (per perf feedback).
    assert jnp.allclose(out, ref, atol=2e-2, rtol=2e-2), float(jnp.max(jnp.abs(out - ref)))

    print("KERNEL_OK")
</pallas_src>

<mosaic_0001>
module attributes {stable_mosaic.version = 11 : i64} {
  func.func @decoder_layer_kernel(%arg0: memref<16x32xf32, #tpu.memory_space<vmem>>, %arg1: memref<32x32xf32, #tpu.memory_space<vmem>>, %arg2: memref<16x16xf32, #tpu.memory_space<vmem>>, %arg3: memref<16x32xf32, #tpu.memory_space<vmem>>, %arg4: memref<32x96xf32, #tpu.memory_space<vmem>>, %arg5: memref<1x96xf32, #tpu.memory_space<vmem>>, %arg6: memref<32x32xf32, #tpu.memory_space<vmem>>, %arg7: memref<1x32xf32, #tpu.memory_space<vmem>>, %arg8: memref<32x32xf32, #tpu.memory_space<vmem>>, %arg9: memref<1x32xf32, #tpu.memory_space<vmem>>, %arg10: memref<32x64xf32, #tpu.memory_space<vmem>>, %arg11: memref<1x64xf32, #tpu.memory_space<vmem>>, %arg12: memref<32x32xf32, #tpu.memory_space<vmem>>, %arg13: memref<1x32xf32, #tpu.memory_space<vmem>>, %arg14: memref<32x64xf32, #tpu.memory_space<vmem>>, %arg15: memref<1x64xf32, #tpu.memory_space<vmem>>, %arg16: memref<64x32xf32, #tpu.memory_space<vmem>>, %arg17: memref<1x32xf32, #tpu.memory_space<vmem>>, %arg18: memref<3x32xf32, #tpu.memory_space<vmem>>, %arg19: memref<3x32xf32, #tpu.memory_space<vmem>>, %arg20: memref<16x32xf32, #tpu.memory_space<vmem>>) attributes {dimension_semantics = [], scalar_prefetch = 0 : i64, scratch_operands = 0 : i64, tpu.core_type = #tpu.core_type<tc>} {
    %c0 = arith.constant 0 : index
    %c0_0 = arith.constant 0 : index
    %0 = vector.load %arg0[%c0, %c0_0] : memref<16x32xf32, #tpu.memory_space<vmem>>, vector<16x32xf32>
    %c0_1 = arith.constant 0 : index
    %c0_2 = arith.constant 0 : index
    %1 = vector.load %arg1[%c0_1, %c0_2] : memref<32x32xf32, #tpu.memory_space<vmem>>, vector<32x32xf32>
    %c0_3 = arith.constant 0 : index
    %c0_4 = arith.constant 0 : index
    %2 = vector.load %arg18[%c0_3, %c0_4] : memref<3x32xf32, #tpu.memory_space<vmem>>, vector<3x32xf32>
    %c0_5 = arith.constant 0 : index
    %c0_6 = arith.constant 0 : index
    %3 = vector.load %arg19[%c0_5, %c0_6] : memref<3x32xf32, #tpu.memory_space<vmem>>, vector<3x32xf32>
    %4 = vector.extract_strided_slice %2 {offsets = [0, 0], sizes = [1, 32], strides = [1, 1]} : vector<3x32xf32> to vector<1x32xf32>
    %5 = vector.extract_strided_slice %3 {offsets = [0, 0], sizes = [1, 32], strides = [1, 1]} : vector<3x32xf32> to vector<1x32xf32>
    %cst = arith.constant dense<0.000000e+00> : vector<16xf32>
    %6 = vector.multi_reduction <add>, %0, %cst [1] : vector<16x32xf32> to vector<16xf32>
    %7 = vector.shape_cast %6 : vector<16xf32> to vector<16x1xf32>
    %cst_7 = arith.constant 3.200000e+01 : f32
    %8 = vector.broadcast %cst_7 : f32 to vector<16x1xf32>
    %9 = arith.divf %7, %8 : vector<16x1xf32>
    %10 = vector.broadcast %9 : vector<16x1xf32> to vector<16x32xf32>
    %11 = arith.subf %0, %10 : vector<16x32xf32>
    %12 = arith.mulf %11, %11 : vector<16x32xf32>
    %cst_8 = arith.constant dense<0.000000e+00> : vector<16xf32>
    %13 = vector.multi_reduction <add>, %12, %cst_8 [1] : vector<16x32xf32> to vector<16xf32>
    %14 = vector.shape_cast %13 : vector<16xf32> to vector<16x1xf32>
    %cst_9 = arith.constant 3.100000e+01 : f32
    %15 = vector.broadcast %cst_9 : f32 to vector<16x1xf32>
    %16 = arith.divf %14, %15 : vector<16x1xf32>
    %17 = vector.broadcast %9 : vector<16x1xf32> to vector<16x32xf32>
    %18 = arith.subf %0, %17 : vector<16x32xf32>
    %19 = vector.broadcast %4 : vector<1x32xf32> to vector<16x32xf32>
    %20 = arith.mulf %19, %18 : vector<16x32xf32>
    %21 = math.sqrt %16 : vector<16x1xf32>
    %cst_10 = arith.constant 9.99999997E-7 : f32
    %22 = vector.broadcast %cst_10 : f32 to vector<16x1xf32>
    %23 = arith.addf %21, %22 : vector<16x1xf32>
    %24 = vector.broadcast %23 : vector<16x1xf32> to vector<16x32xf32>
    %25 = arith.divf %20, %24 : vector<16x32xf32>
    %26 = vector.broadcast %5 : vector<1x32xf32> to vector<16x32xf32>
    %27 = arith.addf %25, %26 : vector<16x32xf32>
    %c0_11 = arith.constant 0 : index
    %c0_12 = arith.constant 0 : index
    %28 = vector.load %arg4[%c0_11, %c0_12] : memref<32x96xf32, #tpu.memory_space<vmem>>, vector<32x96xf32>
    %cst_13 = arith.constant dense<0.000000e+00> : vector<16x96xf32>
    %29 = tpu.matmul %27, %28, %cst_13 {dimension_numbers = #tpu.dot_dimension_numbers<[1], [0], [0], [1], [0, 0, 1, 1], [], []>} : vector<16x32xf32>, vector<32x96xf32>, vector<16x96xf32> -> vector<16x96xf32>
    %c0_14 = arith.constant 0 : index
    %c0_15 = arith.constant 0 : index
    %30 = vector.load %arg5[%c0_14, %c0_15] : memref<1x96xf32, #tpu.memory_space<vmem>>, vector<1x96xf32>
    %31 = vector.broadcast %30 : vector<1x96xf32> to vector<16x96xf32>
    %32 = arith.addf %29, %31 : vector<16x96xf32>
    %33 = vector.extract_strided_slice %32 {offsets = [0, 0], sizes = [16, 32], strides = [1, 1]} : vector<16x96xf32> to vector<16x32xf32>
    %34 = vector.extract_strided_slice %32 {offsets = [0, 32], sizes = [16, 32], strides = [1, 1]} : vector<16x96xf32> to vector<16x32xf32>
    %35 = vector.extract_strided_slice %32 {offsets = [0, 64], sizes = [16, 32], strides = [1, 1]} : vector<16x96xf32> to vector<16x32xf32>
    %c0_16 = arith.constant 0 : index
    %c0_17 = arith.constant 0 : index
    %36 = vector.load %arg2[%c0_16, %c0_17] : memref<16x16xf32, #tpu.memory_space<vmem>>, vector<16x16xf32>
    %c0_18 = arith.constant 0 : index
    %c0_19 = arith.constant 0 : index
    %37 = vector.load %arg6[%c0_18, %c0_19] : memref<32x32xf32, #tpu.memory_space<vmem>>, vector<32x32xf32>
    %c0_20 = arith.constant 0 : index
    %c0_21 = arith.constant 0 : index
    %38 = vector.load %arg7[%c0_20, %c0_21] : memref<1x32xf32, #tpu.memory_space<vmem>>, vector<1x32xf32>
    %39 = vector.extract_strided_slice %33 {offsets = [0, 0], sizes = [16, 8], strides = [1, 1]} : vector<16x32xf32> to vector<16x8xf32>
    %40 = vector.extract_strided_slice %34 {offsets = [0, 0], sizes = [16, 8], strides = [1, 1]} : vector<16x32xf32> to vector<16x8xf32>
    %41 = vector.extract_strided_slice %35 {offsets = [0, 0], sizes = [16, 8], strides = [1, 1]} : vector<16x32xf32> to vector<16x8xf32>
    %cst_22 = arith.constant dense<0.000000e+00> : vector<16x16xf32>
    %42 = tpu.matmul %39, %40, %cst_22 {dimension_numbers = #tpu.dot_dimension_numbers<[1], [1], [0], [0], [0, 0, 1, 0], [], []>} : vector<16x8xf32>, vector<16x8xf32>, vector<16x16xf32> -> vector<16x16xf32>
    %43 = arith.addf %42, %36 : vector<16x16xf32>
    %cst_23 = arith.constant dense<0xFF800000> : vector<16xf32>
    %44 = vector.multi_reduction <maximumf>, %43, %cst_23 [1] : vector<16x16xf32> to vector<16xf32>
    %45 = vector.shape_cast %44 : vector<16xf32> to vector<16x1xf32>
    %46 = vector.broadcast %45 : vector<16x1xf32> to vector<16x16xf32>
    %47 = arith.subf %43, %46 : vector<16x16xf32>
    %48 = math.exp %47 : vector<16x16xf32>
    %cst_24 = arith.constant dense<0.000000e+00> : vector<16xf32>
    %49 = vector.multi_reduction <add>, %48, %cst_24 [1] : vector<16x16xf32> to vector<16xf32>
    %50 = vector.shape_cast %49 : vector<16xf32> to vector<16x1xf32>
    %51 = tpu.reciprocal %50 {approx = true} : vector<16x1xf32> -> vector<16x1xf32>
    %52 = vector.broadcast %51 : vector<16x1xf32> to vector<16x16xf32>
    %53 = arith.mulf %48, %52 : vector<16x16xf32>
    %cst_25 = arith.constant dense<0.000000e+00> : vector<16x8xf32>
    %54 = tpu.matmul %53, %41, %cst_25 {dimension_numbers = #tpu.dot_dimension_numbers<[1], [0], [0], [1], [0, 0, 1, 1], [], []>} : vector<16x16xf32>, vector<16x8xf32>, vector<16x8xf32> -> vector<16x8xf32>
    %55 = vector.extract_strided_slice %37 {offsets = [0, 0], sizes = [8, 32], strides = [1, 1]} : vector<32x32xf32> to vector<8x32xf32>
    %cst_26 = arith.constant dense<0.000000e+00> : vector<16x32xf32>
    %56 = tpu.matmul %54, %55, %cst_26 {dimension_numbers = #tpu.dot_dimension_numbers<[1], [0], [0], [1], [0, 0, 1, 1], [], []>} : vector<16x8xf32>, vector<8x32xf32>, vector<16x32xf32> -> vector<16x32xf32>
    %57 = vector.extract_strided_slice %33 {offsets = [0, 8], sizes = [16, 8], strides = [1, 1]} : vector<16x32xf32> to vector<16x8xf32>
    %58 = vector.extract_strided_slice %34 {offsets = [0, 8], sizes = [16, 8], strides = [1, 1]} : vector<16x32xf32> to vector<16x8xf32>
    %59 = vector.extract_strided_slice %35 {offsets = [0, 8], sizes = [16, 8], strides = [1, 1]} : vector<16x32xf32> to vector<16x8xf32>
    %cst_27 = arith.constant dense<0.000000e+00> : vector<16x16xf32>
    %60 = tpu.matmul %57, %58, %cst_27 {dimension_numbers = #tpu.dot_dimension_numbers<[1], [1], [0], [0], [0, 0, 1, 0], [], []>} : vector<16x8xf32>, vector<16x8xf32>, vector<16x16xf32> -> vector<16x16xf32>
    %61 = arith.addf %60, %36 : vector<16x16xf32>
    %cst_28 = arith.constant dense<0xFF800000> : vector<16xf32>
    %62 = vector.multi_reduction <maximumf>, %61, %cst_28 [1] : vector<16x16xf32> to vector<16xf32>
    %63 = vector.shape_cast %62 : vector<16xf32> to vector<16x1xf32>
    %64 = vector.broadcast %63 : vector<16x1xf32> to vector<16x16xf32>
    %65 = arith.subf %61, %64 : vector<16x16xf32>
    %66 = math.exp %65 : vector<16x16xf32>
    %cst_29 = arith.constant dense<0.000000e+00> : vector<16xf32>
    %67 = vector.multi_reduction <add>, %66, %cst_29 [1] : vector<16x16xf32> to vector<16xf32>
    %68 = vector.shape_cast %67 : vector<16xf32> to vector<16x1xf32>
    %69 = tpu.reciprocal %68 {approx = true} : vector<16x1xf32> -> vector<16x1xf32>
    %70 = vector.broadcast %69 : vector<16x1xf32> to vector<16x16xf32>
    %71 = arith.mulf %66, %70 : vector<16x16xf32>
    %cst_30 = arith.constant dense<0.000000e+00> : vector<16x8xf32>
    %72 = tpu.matmul %71, %59, %cst_30 {dimension_numbers = #tpu.dot_dimension_numbers<[1], [0], [0], [1], [0, 0, 1, 1], [], []>} : vector<16x16xf32>, vector<16x8xf32>, vector<16x8xf32> -> vector<16x8xf32>
    %73 = vector.extract_strided_slice %37 {offsets = [8, 0], sizes = [8, 32], strides = [1, 1]} : vector<32x32xf32> to vector<8x32xf32>
    %cst_31 = arith.constant dense<0.000000e+00> : vector<16x32xf32>
    %74 = tpu.matmul %72, %73, %cst_31 {dimension_numbers = #tpu.dot_dimension_numbers<[1], [0], [0], [1], [0, 0, 1, 1], [], []>} : vector<16x8xf32>, vector<8x32xf32>, vector<16x32xf32> -> vector<16x32xf32>
    %75 = arith.addf %56, %74 : vector<16x32xf32>
    %76 = vector.extract_strided_slice %33 {offsets = [0, 16], sizes = [16, 8], strides = [1, 1]} : vector<16x32xf32> to vector<16x8xf32>
    %77 = vector.extract_strided_slice %34 {offsets = [0, 16], sizes = [16, 8], strides = [1, 1]} : vector<16x32xf32> to vector<16x8xf32>
    %78 = vector.extract_strided_slice %35 {offsets = [0, 16], sizes = [16, 8], strides = [1, 1]} : vector<16x32xf32> to vector<16x8xf32>
    %cst_32 = arith.constant dense<0.000000e+00> : vector<16x16xf32>
    %79 = tpu.matmul %76, %77, %cst_32 {dimension_numbers = #tpu.dot_dimension_numbers<[1], [1], [0], [0], [0, 0, 1, 0], [], []>} : vector<16x8xf32>, vector<16x8xf32>, vector<16x16xf32> -> vector<16x16xf32>
    %80 = arith.addf %79, %36 : vector<16x16xf32>
    %cst_33 = arith.constant dense<0xFF800000> : vector<16xf32>
    %81 = vector.multi_reduction <maximumf>, %80, %cst_33 [1] : vector<16x16xf32> to vector<16xf32>
    %82 = vector.shape_cast %81 : vector<16xf32> to vector<16x1xf32>
    %83 = vector.broadcast %82 : vector<16x1xf32> to vector<16x16xf32>
    %84 = arith.subf %80, %83 : vector<16x16xf32>
    %85 = math.exp %84 : vector<16x16xf32>
    %cst_34 = arith.constant dense<0.000000e+00> : vector<16xf32>
    %86 = vector.multi_reduction <add>, %85, %cst_34 [1] : vector<16x16xf32> to vector<16xf32>
    %87 = vector.shape_cast %86 : vector<16xf32> to vector<16x1xf32>
    %88 = tpu.reciprocal %87 {approx = true} : vector<16x1xf32> -> vector<16x1xf32>
    %89 = vector.broadcast %88 : vector<16x1xf32> to vector<16x16xf32>
    %90 = arith.mulf %85, %89 : vector<16x16xf32>
    %cst_35 = arith.constant dense<0.000000e+00> : vector<16x8xf32>
    %91 = tpu.matmul %90, %78, %cst_35 {dimension_numbers = #tpu.dot_dimension_numbers<[1], [0], [0], [1], [0, 0, 1, 1], [], []>} : vector<16x16xf32>, vector<16x8xf32>, vector<16x8xf32> -> vector<16x8xf32>
    %92 = vector.extract_strided_slice %37 {offsets = [16, 0], sizes = [8, 32], strides = [1, 1]} : vector<32x32xf32> to vector<8x32xf32>
    %cst_36 = arith.constant dense<0.000000e+00> : vector<16x32xf32>
    %93 = tpu.matmul %91, %92, %cst_36 {dimension_numbers = #tpu.dot_dimension_numbers<[1], [0], [0], [1], [0, 0, 1, 1], [], []>} : vector<16x8xf32>, vector<8x32xf32>, vector<16x32xf32> -> vector<16x32xf32>
    %94 = arith.addf %75, %93 : vector<16x32xf32>
    %95 = vector.extract_strided_slice %33 {offsets = [0, 24], sizes = [16, 8], strides = [1, 1]} : vector<16x32xf32> to vector<16x8xf32>
    %96 = vector.extract_strided_slice %34 {offsets = [0, 24], sizes = [16, 8], strides = [1, 1]} : vector<16x32xf32> to vector<16x8xf32>
    %97 = vector.extract_strided_slice %35 {offsets = [0, 24], sizes = [16, 8], strides = [1, 1]} : vector<16x32xf32> to vector<16x8xf32>
    %cst_37 = arith.constant dense<0.000000e+00> : vector<16x16xf32>
    %98 = tpu.matmul %95, %96, %cst_37 {dimension_numbers = #tpu.dot_dimension_numbers<[1], [1], [0], [0], [0, 0, 1, 0], [], []>} : vector<16x8xf32>, vector<16x8xf32>, vector<16x16xf32> -> vector<16x16xf32>
    %99 = arith.addf %98, %36 : vector<16x16xf32>
    %cst_38 = arith.constant dense<0xFF800000> : vector<16xf32>
    %100 = vector.multi_reduction <maximumf>, %99, %cst_38 [1] : vector<16x16xf32> to vector<16xf32>
    %101 = vector.shape_cast %100 : vector<16xf32> to vector<16x1xf32>
    %102 = vector.broadcast %101 : vector<16x1xf32> to vector<16x16xf32>
    %103 = arith.subf %99, %102 : vector<16x16xf32>
    %104 = math.exp %103 : vector<16x16xf32>
    %cst_39 = arith.constant dense<0.000000e+00> : vector<16xf32>
    %105 = vector.multi_reduction <add>, %104, %cst_39 [1] : vector<16x16xf32> to vector<16xf32>
    %106 = vector.shape_cast %105 : vector<16xf32> to vector<16x1xf32>
    %107 = tpu.reciprocal %106 {approx = true} : vector<16x1xf32> -> vector<16x1xf32>
    %108 = vector.broadcast %107 : vector<16x1xf32> to vector<16x16xf32>
    %109 = arith.mulf %104, %108 : vector<16x16xf32>
    %cst_40 = arith.constant dense<0.000000e+00> : vector<16x8xf32>
    %110 = tpu.matmul %109, %97, %cst_40 {dimension_numbers = #tpu.dot_dimension_numbers<[1], [0], [0], [1], [0, 0, 1, 1], [], []>} : vector<16x16xf32>, vector<16x8xf32>, vector<16x8xf32> -> vector<16x8xf32>
    %111 = vector.extract_strided_slice %37 {offsets = [24, 0], sizes = [8, 32], strides = [1, 1]} : vector<32x32xf32> to vector<8x32xf32>
    %cst_41 = arith.constant dense<0.000000e+00> : vector<16x32xf32>
    %112 = tpu.matmul %110, %111, %cst_41 {dimension_numbers = #tpu.dot_dimension_numbers<[1], [0], [0], [1], [0, 0, 1, 1], [], []>} : vector<16x8xf32>, vector<8x32xf32>, vector<16x32xf32> -> vector<16x32xf32>
    %113 = arith.addf %94, %112 : vector<16x32xf32>
    %114 = vector.broadcast %38 : vector<1x32xf32> to vector<16x32xf32>
    %115 = arith.addf %113, %114 : vector<16x32xf32>
    %116 = arith.addf %0, %115 : vector<16x32xf32>
    %117 = vector.extract_strided_slice %2 {offsets = [1, 0], sizes = [1, 32], strides = [1, 1]} : vector<3x32xf32> to vector<1x32xf32>
    %118 = vector.extract_strided_slice %3 {offsets = [1, 0], sizes = [1, 32], strides = [1, 1]} : vector<3x32xf32> to vector<1x32xf32>
    %cst_42 = arith.constant dense<0.000000e+00> : vector<16xf32>
    %119 = vector.multi_reduction <add>, %116, %cst_42 [1] : vector<16x32xf32> to vector<16xf32>
    %120 = vector.shape_cast %119 : vector<16xf32> to vector<16x1xf32>
    %cst_43 = arith.constant 3.200000e+01 : f32
    %121 = vector.broadcast %cst_43 : f32 to vector<16x1xf32>
    %122 = arith.divf %120, %121 : vector<16x1xf32>
    %123 = vector.broadcast %122 : vector<16x1xf32> to vector<16x32xf32>
    %124 = arith.subf %116, %123 : vector<16x32xf32>
    %125 = arith.mulf %124, %124 : vector<16x32xf32>
    %cst_44 = arith.constant dense<0.000000e+00> : vector<16xf32>
    %126 = vector.multi_reduction <add>, %125, %cst_44 [1] : vector<16x32xf32> to vector<16xf32>
    %127 = vector.shape_cast %126 : vector<16xf32> to vector<16x1xf32>
    %cst_45 = arith.constant 3.100000e+01 : f32
    %128 = vector.broadcast %cst_45 : f32 to vector<16x1xf32>
    %129 = arith.divf %127, %128 : vector<16x1xf32>
    %130 = vector.broadcast %122 : vector<16x1xf32> to vector<16x32xf32>
    %131 = arith.subf %116, %130 : vector<16x32xf32>
    %132 = vector.broadcast %117 : vector<1x32xf32> to vector<16x32xf32>
    %133 = arith.mulf %132, %131 : vector<16x32xf32>
    %134 = math.sqrt %129 : vector<16x1xf32>
    %cst_46 = arith.constant 9.99999997E-7 : f32
    %135 = vector.broadcast %cst_46 : f32 to vector<16x1xf32>
    %136 = arith.addf %134, %135 : vector<16x1xf32>
    %137 = vector.broadcast %136 : vector<16x1xf32> to vector<16x32xf32>
    %138 = arith.divf %133, %137 : vector<16x32xf32>
    %139 = vector.broadcast %118 : vector<1x32xf32> to vector<16x32xf32>
    %140 = arith.addf %138, %139 : vector<16x32xf32>
    %c0_47 = arith.constant 0 : index
    %c0_48 = arith.constant 0 : index
    %141 = vector.load %arg8[%c0_47, %c0_48] : memref<32x32xf32, #tpu.memory_space<vmem>>, vector<32x32xf32>
    %cst_49 = arith.constant dense<0.000000e+00> : vector<16x32xf32>
    %142 = tpu.matmul %140, %141, %cst_49 {dimension_numbers = #tpu.dot_dimension_numbers<[1], [0], [0], [1], [0, 0, 1, 1], [], []>} : vector<16x32xf32>, vector<32x32xf32>, vector<16x32xf32> -> vector<16x32xf32>
    %c0_50 = arith.constant 0 : index
    %c0_51 = arith.constant 0 : index
    %143 = vector.load %arg9[%c0_50, %c0_51] : memref<1x32xf32, #tpu.memory_space<vmem>>, vector<1x32xf32>
    %144 = vector.broadcast %143 : vector<1x32xf32> to vector<16x32xf32>
    %145 = arith.addf %142, %144 : vector<16x32xf32>
    %c0_52 = arith.constant 0 : index
    %c0_53 = arith.constant 0 : index
    %146 = vector.load %arg10[%c0_52, %c0_53] : memref<32x64xf32, #tpu.memory_space<vmem>>, vector<32x64xf32>
    %cst_54 = arith.constant dense<0.000000e+00> : vector<32x64xf32>
    %147 = tpu.matmul %1, %146, %cst_54 {dimension_numbers = #tpu.dot_dimension_numbers<[1], [0], [0], [1], [0, 0, 1, 1], [], []>} : vector<32x32xf32>, vector<32x64xf32>, vector<32x64xf32> -> vector<32x64xf32>
    %c0_55 = arith.constant 0 : index
    %c0_56 = arith.constant 0 : index
    %148 = vector.load %arg11[%c0_55, %c0_56] : memref<1x64xf32, #tpu.memory_space<vmem>>, vector<1x64xf32>
    %149 = vector.broadcast %148 : vector<1x64xf32> to vector<32x64xf32>
    %150 = arith.addf %147, %149 : vector<32x64xf32>
    %151 = vector.extract_strided_slice %150 {offsets = [0, 0], sizes = [32, 32], strides = [1, 1]} : vector<32x64xf32> to vector<32x32xf32>
    %152 = vector.extract_strided_slice %150 {offsets = [0, 32], sizes = [32, 32], strides = [1, 1]} : vector<32x64xf32> to vector<32x32xf32>
    %c0_57 = arith.constant 0 : index
    %c0_58 = arith.constant 0 : index
    %153 = vector.load %arg3[%c0_57, %c0_58] : memref<16x32xf32, #tpu.memory_space<vmem>>, vector<16x32xf32>
    %c0_59 = arith.constant 0 : index
    %c0_60 = arith.constant 0 : index
    %154 = vector.load %arg12[%c0_59, %c0_60] : memref<32x32xf32, #tpu.memory_space<vmem>>, vector<32x32xf32>
    %c0_61 = arith.constant 0 : index
    %c0_62 = arith.constant 0 : index
    %155 = vector.load %arg13[%c0_61, %c0_62] : memref<1x32xf32, #tpu.memory_space<vmem>>, vector<1x32xf32>
    %156 = vector.extract_strided_slice %145 {offsets = [0, 0], sizes = [16, 8], strides = [1, 1]} : vector<16x32xf32> to vector<16x8xf32>
    %157 = vector.extract_strided_slice %151 {offsets = [0, 0], sizes = [32, 8], strides = [1, 1]} : vector<32x32xf32> to vector<32x8xf32>
    %158 = vector.extract_strided_slice %152 {offsets = [0, 0], sizes = [32, 8], strides = [1, 1]} : vector<32x32xf32> to vector<32x8xf32>
    %cst_63 = arith.constant dense<0.000000e+00> : vector<16x32xf32>
    %159 = tpu.matmul %156, %157, %cst_63 {dimension_numbers = #tpu.dot_dimension_numbers<[1], [1], [0], [0], [0, 0, 1, 0], [], []>} : vector<16x8xf32>, vector<32x8xf32>, vector<16x32xf32> -> vector<16x32xf32>
    %160 = arith.addf %159, %153 : vector<16x32xf32>
    %cst_64 = arith.constant dense<0xFF800000> : vector<16xf32>
    %161 = vector.multi_reduction <maximumf>, %160, %cst_64 [1] : vector<16x32xf32> to vector<16xf32>
    %162 = vector.shape_cast %161 : vector<16xf32> to vector<16x1xf32>
    %163 = vector.broadcast %162 : vector<16x1xf32> to vector<16x32xf32>
    %164 = arith.subf %160, %163 : vector<16x32xf32>
    %165 = math.exp %164 : vector<16x32xf32>
    %cst_65 = arith.constant dense<0.000000e+00> : vector<16xf32>
    %166 = vector.multi_reduction <add>, %165, %cst_65 [1] : vector<16x32xf32> to vector<16xf32>
    %167 = vector.shape_cast %166 : vector<16xf32> to vector<16x1xf32>
    %168 = tpu.reciprocal %167 {approx = true} : vector<16x1xf32> -> vector<16x1xf32>
    %169 = vector.broadcast %168 : vector<16x1xf32> to vector<16x32xf32>
    %170 = arith.mulf %165, %169 : vector<16x32xf32>
    %cst_66 = arith.constant dense<0.000000e+00> : vector<16x8xf32>
    %171 = tpu.matmul %170, %158, %cst_66 {dimension_numbers = #tpu.dot_dimension_numbers<[1], [0], [0], [1], [0, 0, 1, 1], [], []>} : vector<16x32xf32>, vector<32x8xf32>, vector<16x8xf32> -> vector<16x8xf32>
    %172 = vector.extract_strided_slice %154 {offsets = [0, 0], sizes = [8, 32], strides = [1, 1]} : vector<32x32xf32> to vector<8x32xf32>
    %cst_67 = arith.constant dense<0.000000e+00> : vector<16x32xf32>
    %173 = tpu.matmul %171, %172, %cst_67 {dimension_numbers = #tpu.dot_dimension_numbers<[1], [0], [0], [1], [0, 0, 1, 1], [], []>} : vector<16x8xf32>, vector<8x32xf32>, vector<16x32xf32> -> vector<16x32xf32>
    %174 = vector.extract_strided_slice %145 {offsets = [0, 8], sizes = [16, 8], strides = [1, 1]} : vector<16x32xf32> to vector<16x8xf32>
    %175 = vector.extract_strided_slice %151 {offsets = [0, 8], sizes = [32, 8], strides = [1, 1]} : vector<32x32xf32> to vector<32x8xf32>
    %176 = vector.extract_strided_slice %152 {offsets = [0, 8], sizes = [32, 8], strides = [1, 1]} : vector<32x32xf32> to vector<32x8xf32>
    %cst_68 = arith.constant dense<0.000000e+00> : vector<16x32xf32>
    %177 = tpu.matmul %174, %175, %cst_68 {dimension_numbers = #tpu.dot_dimension_numbers<[1], [1], [0], [0], [0, 0, 1, 0], [], []>} : vector<16x8xf32>, vector<32x8xf32>, vector<16x32xf32> -> vector<16x32xf32>
    %178 = arith.addf %177, %153 : vector<16x32xf32>
    %cst_69 = arith.constant dense<0xFF800000> : vector<16xf32>
    %179 = vector.multi_reduction <maximumf>, %178, %cst_69 [1] : vector<16x32xf32> to vector<16xf32>
    %180 = vector.shape_cast %179 : vector<16xf32> to vector<16x1xf32>
    %181 = vector.broadcast %180 : vector<16x1xf32> to vector<16x32xf32>
    %182 = arith.subf %178, %181 : vector<16x32xf32>
    %183 = math.exp %182 : vector<16x32xf32>
    %cst_70 = arith.constant dense<0.000000e+00> : vector<16xf32>
    %184 = vector.multi_reduction <add>, %183, %cst_70 [1] : vector<16x32xf32> to vector<16xf32>
    %185 = vector.shape_cast %184 : vector<16xf32> to vector<16x1xf32>
    %186 = tpu.reciprocal %185 {approx = true} : vector<16x1xf32> -> vector<16x1xf32>
    %187 = vector.broadcast %186 : vector<16x1xf32> to vector<16x32xf32>
    %188 = arith.mulf %183, %187 : vector<16x32xf32>
    %cst_71 = arith.constant dense<0.000000e+00> : vector<16x8xf32>
    %189 = tpu.matmul %188, %176, %cst_71 {dimension_numbers = #tpu.dot_dimension_numbers<[1], [0], [0], [1], [0, 0, 1, 1], [], []>} : vector<16x32xf32>, vector<32x8xf32>, vector<16x8xf32> -> vector<16x8xf32>
    %190 = vector.extract_strided_slice %154 {offsets = [8, 0], sizes = [8, 32], strides = [1, 1]} : vector<32x32xf32> to vector<8x32xf32>
    %cst_72 = arith.constant dense<0.000000e+00> : vector<16x32xf32>
    %191 = tpu.matmul %189, %190, %cst_72 {dimension_numbers = #tpu.dot_dimension_numbers<[1], [0], [0], [1], [0, 0, 1, 1], [], []>} : vector<16x8xf32>, vector<8x32xf32>, vector<16x32xf32> -> vector<16x32xf32>
    %192 = arith.addf %173, %191 : vector<16x32xf32>
    %193 = vector.extract_strided_slice %145 {offsets = [0, 16], sizes = [16, 8], strides = [1, 1]} : vector<16x32xf32> to vector<16x8xf32>
    %194 = vector.extract_strided_slice %151 {offsets = [0, 16], sizes = [32, 8], strides = [1, 1]} : vector<32x32xf32> to vector<32x8xf32>
    %195 = vector.extract_strided_slice %152 {offsets = [0, 16], sizes = [32, 8], strides = [1, 1]} : vector<32x32xf32> to vector<32x8xf32>
    %cst_73 = arith.constant dense<0.000000e+00> : vector<16x32xf32>
    %196 = tpu.matmul %193, %194, %cst_73 {dimension_numbers = #tpu.dot_dimension_numbers<[1], [1], [0], [0], [0, 0, 1, 0], [], []>} : vector<16x8xf32>, vector<32x8xf32>, vector<16x32xf32> -> vector<16x32xf32>
    %197 = arith.addf %196, %153 : vector<16x32xf32>
    %cst_74 = arith.constant dense<0xFF800000> : vector<16xf32>
    %198 = vector.multi_reduction <maximumf>, %197, %cst_74 [1] : vector<16x32xf32> to vector<16xf32>
    %199 = vector.shape_cast %198 : vector<16xf32> to vector<16x1xf32>
    %200 = vector.broadcast %199 : vector<16x1xf32> to vector<16x32xf32>
    %201 = arith.subf %197, %200 : vector<16x32xf32>
    %202 = math.exp %201 : vector<16x32xf32>
    %cst_75 = arith.constant dense<0.000000e+00> : vector<16xf32>
    %203 = vector.multi_reduction <add>, %202, %cst_75 [1] : vector<16x32xf32> to vector<16xf32>
    %204 = vector.shape_cast %203 : vector<16xf32> to vector<16x1xf32>
    %205 = tpu.reciprocal %204 {approx = true} : vector<16x1xf32> -> vector<16x1xf32>
    %206 = vector.broadcast %205 : vector<16x1xf32> to vector<16x32xf32>
    %207 = arith.mulf %202, %206 : vector<16x32xf32>
    %cst_76 = arith.constant dense<0.000000e+00> : vector<16x8xf32>
    %208 = tpu.matmul %207, %195, %cst_76 {dimension_numbers = #tpu.dot_dimension_numbers<[1], [0], [0], [1], [0, 0, 1, 1], [], []>} : vector<16x32xf32>, vector<32x8xf32>, vector<16x8xf32> -> vector<16x8xf32>
    %209 = vector.extract_strided_slice %154 {offsets = [16, 0], sizes = [8, 32], strides = [1, 1]} : vector<32x32xf32> to vector<8x32xf32>
    %cst_77 = arith.constant dense<0.000000e+00> : vector<16x32xf32>
    %210 = tpu.matmul %208, %209, %cst_77 {dimension_numbers = #tpu.dot_dimension_numbers<[1], [0], [0], [1], [0, 0, 1, 1], [], []>} : vector<16x8xf32>, vector<8x32xf32>, vector<16x32xf32> -> vector<16x32xf32>
    %211 = arith.addf %192, %210 : vector<16x32xf32>
    %212 = vector.extract_strided_slice %145 {offsets = [0, 24], sizes = [16, 8], strides = [1, 1]} : vector<16x32xf32> to vector<16x8xf32>
    %213 = vector.extract_strided_slice %151 {offsets = [0, 24], sizes = [32, 8], strides = [1, 1]} : vector<32x32xf32> to vector<32x8xf32>
    %214 = vector.extract_strided_slice %152 {offsets = [0, 24], sizes = [32, 8], strides = [1, 1]} : vector<32x32xf32> to vector<32x8xf32>
    %cst_78 = arith.constant dense<0.000000e+00> : vector<16x32xf32>
    %215 = tpu.matmul %212, %213, %cst_78 {dimension_numbers = #tpu.dot_dimension_numbers<[1], [1], [0], [0], [0, 0, 1, 0], [], []>} : vector<16x8xf32>, vector<32x8xf32>, vector<16x32xf32> -> vector<16x32xf32>
    %216 = arith.addf %215, %153 : vector<16x32xf32>
    %cst_79 = arith.constant dense<0xFF800000> : vector<16xf32>
    %217 = vector.multi_reduction <maximumf>, %216, %cst_79 [1] : vector<16x32xf32> to vector<16xf32>
    %218 = vector.shape_cast %217 : vector<16xf32> to vector<16x1xf32>
    %219 = vector.broadcast %218 : vector<16x1xf32> to vector<16x32xf32>
    %220 = arith.subf %216, %219 : vector<16x32xf32>
    %221 = math.exp %220 : vector<16x32xf32>
    %cst_80 = arith.constant dense<0.000000e+00> : vector<16xf32>
    %222 = vector.multi_reduction <add>, %221, %cst_80 [1] : vector<16x32xf32> to vector<16xf32>
    %223 = vector.shape_cast %222 : vector<16xf32> to vector<16x1xf32>
    %224 = tpu.reciprocal %223 {approx = true} : vector<16x1xf32> -> vector<16x1xf32>
    %225 = vector.broadcast %224 : vector<16x1xf32> to vector<16x32xf32>
    %226 = arith.mulf %221, %225 : vector<16x32xf32>
    %cst_81 = arith.constant dense<0.000000e+00> : vector<16x8xf32>
    %227 = tpu.matmul %226, %214, %cst_81 {dimension_numbers = #tpu.dot_dimension_numbers<[1], [0], [0], [1], [0, 0, 1, 1], [], []>} : vector<16x32xf32>, vector<32x8xf32>, vector<16x8xf32> -> vector<16x8xf32>
    %228 = vector.extract_strided_slice %154 {offsets = [24, 0], sizes = [8, 32], strides = [1, 1]} : vector<32x32xf32> to vector<8x32xf32>
    %cst_82 = arith.constant dense<0.000000e+00> : vector<16x32xf32>
    %229 = tpu.matmul %227, %228, %cst_82 {dimension_numbers = #tpu.dot_dimension_numbers<[1], [0], [0], [1], [0, 0, 1, 1], [], []>} : vector<16x8xf32>, vector<8x32xf32>, vector<16x32xf32> -> vector<16x32xf32>
    %230 = arith.addf %211, %229 : vector<16x32xf32>
    %231 = vector.broadcast %155 : vector<1x32xf32> to vector<16x32xf32>
    %232 = arith.addf %230, %231 : vector<16x32xf32>
    %233 = arith.addf %116, %232 : vector<16x32xf32>
    %234 = vector.extract_strided_slice %2 {offsets = [2, 0], sizes = [1, 32], strides = [1, 1]} : vector<3x32xf32> to vector<1x32xf32>
    %235 = vector.extract_strided_slice %3 {offsets = [2, 0], sizes = [1, 32], strides = [1, 1]} : vector<3x32xf32> to vector<1x32xf32>
    %cst_83 = arith.constant dense<0.000000e+00> : vector<16xf32>
    %236 = vector.multi_reduction <add>, %233, %cst_83 [1] : vector<16x32xf32> to vector<16xf32>
    %237 = vector.shape_cast %236 : vector<16xf32> to vector<16x1xf32>
    %cst_84 = arith.constant 3.200000e+01 : f32
    %238 = vector.broadcast %cst_84 : f32 to vector<16x1xf32>
    %239 = arith.divf %237, %238 : vector<16x1xf32>
    %240 = vector.broadcast %239 : vector<16x1xf32> to vector<16x32xf32>
    %241 = arith.subf %233, %240 : vector<16x32xf32>
    %242 = arith.mulf %241, %241 : vector<16x32xf32>
    %cst_85 = arith.constant dense<0.000000e+00> : vector<16xf32>
    %243 = vector.multi_reduction <add>, %242, %cst_85 [1] : vector<16x32xf32> to vector<16xf32>
    %244 = vector.shape_cast %243 : vector<16xf32> to vector<16x1xf32>
    %cst_86 = arith.constant 3.100000e+01 : f32
    %245 = vector.broadcast %cst_86 : f32 to vector<16x1xf32>
    %246 = arith.divf %244, %245 : vector<16x1xf32>
    %247 = vector.broadcast %239 : vector<16x1xf32> to vector<16x32xf32>
    %248 = arith.subf %233, %247 : vector<16x32xf32>
    %249 = vector.broadcast %234 : vector<1x32xf32> to vector<16x32xf32>
    %250 = arith.mulf %249, %248 : vector<16x32xf32>
    %251 = math.sqrt %246 : vector<16x1xf32>
    %cst_87 = arith.constant 9.99999997E-7 : f32
    %252 = vector.broadcast %cst_87 : f32 to vector<16x1xf32>
    %253 = arith.addf %251, %252 : vector<16x1xf32>
    %254 = vector.broadcast %253 : vector<16x1xf32> to vector<16x32xf32>
    %255 = arith.divf %250, %254 : vector<16x32xf32>
    %256 = vector.broadcast %235 : vector<1x32xf32> to vector<16x32xf32>
    %257 = arith.addf %255, %256 : vector<16x32xf32>
    %c0_88 = arith.constant 0 : index
    %c0_89 = arith.constant 0 : index
    %258 = vector.load %arg14[%c0_88, %c0_89] : memref<32x64xf32, #tpu.memory_space<vmem>>, vector<32x64xf32>
    %cst_90 = arith.constant dense<0.000000e+00> : vector<16x64xf32>
    %259 = tpu.matmul %257, %258, %cst_90 {dimension_numbers = #tpu.dot_dimension_numbers<[1], [0], [0], [1], [0, 0, 1, 1], [], []>} : vector<16x32xf32>, vector<32x64xf32>, vector<16x64xf32> -> vector<16x64xf32>
    %c0_91 = arith.constant 0 : index
    %c0_92 = arith.constant 0 : index
    %260 = vector.load %arg15[%c0_91, %c0_92] : memref<1x64xf32, #tpu.memory_space<vmem>>, vector<1x64xf32>
    %261 = vector.broadcast %260 : vector<1x64xf32> to vector<16x64xf32>
    %262 = arith.addf %259, %261 : vector<16x64xf32>
    %cst_93 = arith.constant 0.000000e+00 : f32
    %263 = vector.broadcast %cst_93 : f32 to vector<16x64xf32>
    %264 = arith.maximumf %262, %263 : vector<16x64xf32>
    %c0_94 = arith.constant 0 : index
    %c0_95 = arith.constant 0 : index
    %265 = vector.load %arg16[%c0_94, %c0_95] : memref<64x32xf32, #tpu.memory_space<vmem>>, vector<64x32xf32>
    %cst_96 = arith.constant dense<0.000000e+00> : vector<16x32xf32>
    %266 = tpu.matmul %264, %265, %cst_96 {dimension_numbers = #tpu.dot_dimension_numbers<[1], [0], [0], [1], [0, 0, 1, 1], [], []>} : vector<16x64xf32>, vector<64x32xf32>, vector<16x32xf32> -> vector<16x32xf32>
    %267 = arith.addf %233, %266 : vector<16x32xf32>
    %c0_97 = arith.constant 0 : index
    %c0_98 = arith.constant 0 : index
    %268 = vector.load %arg17[%c0_97, %c0_98] : memref<1x32xf32, #tpu.memory_space<vmem>>, vector<1x32xf32>
    %269 = vector.broadcast %268 : vector<1x32xf32> to vector<16x32xf32>
    %270 = arith.addf %267, %269 : vector<16x32xf32>
    %c0_99 = arith.constant 0 : index
    %c0_100 = arith.constant 0 : index
    %271 = vector.load %arg20[%c0_99, %c0_100] : memref<16x32xf32, #tpu.memory_space<vmem>>, vector<16x32xf32>
    tpu.vector_store %arg20[%c0_99, %c0_100], %270 {strides = array<i32>} : memref<16x32xf32, #tpu.memory_space<vmem>>, vector<16x32xf32>,
    return
  }
}

</mosaic_0001>

<bundles_post_ra>
// kernel: decoder_layer.1
= control target key start
LH: loop header
LB: loop body
LE: loop exit
PB: predicated region body
PF: predicated region fallthrough
CT: control target
= control target key end

     0   :  { %s4344_s0 = inlined_call_operand.vmem [shape: f32[16,32], index: 0, kind: input, shape index: {}]   ;;  %s4345_s1 = inlined_call_operand.vmem [shape: f32[32,32], index: 1, kind: input, shape index: {}]   ;;  %s4346_s2 = inlined_call_operand.vmem [shape: f32[16,16], index: 2, kind: input, shape index: {}]   ;;  %s4347_s3 = inlined_call_operand.vmem [shape: f32[16,32], index: 3, kind: input, shape index: {}]   ;;  %s4348_s4 = inlined_call_operand.vmem [shape: f32[32,96], index: 4, kind: input, shape index: {}]   ;;  %s4349_s5 = inlined_call_operand.vmem [shape: f32[1,96], index: 5, kind: input, shape index: {}]   ;;  %s4350_s6 = inlined_call_operand.vmem [shape: f32[32,32], index: 6, kind: input, shape index: {}]   ;;  %s4351_s7 = inlined_call_operand.vmem [shape: f32[1,32], index: 7, kind: input, shape index: {}]   ;;  %s4352_s8 = inlined_call_operand.vmem [shape: f32[32,32], index: 8, kind: input, shape index: {}]   ;;  %s4353_s9 = inlined_call_operand.vmem [shape: f32[1,32], index: 9, kind: input, shape index: {}]   ;;  %s4354_s10 = inlined_call_operand.vmem [shape: f32[32,64], index: 10, kind: input, shape index: {}]   ;;  %s4355_s11 = inlined_call_operand.vmem [shape: f32[1,64], index: 11, kind: input, shape index: {}]   ;;  %s4356_s12 = inlined_call_operand.vmem [shape: f32[32,32], index: 12, kind: input, shape index: {}]   ;;  %s4357_s13 = inlined_call_operand.vmem [shape: f32[1,32], index: 13, kind: input, shape index: {}]   ;;  %s4358_s14 = inlined_call_operand.vmem [shape: f32[32,64], index: 14, kind: input, shape index: {}]   ;;  %s4359_s15 = inlined_call_operand.vmem [shape: f32[1,64], index: 15, kind: input, shape index: {}]   ;;  %s4360_s16 = inlined_call_operand.vmem [shape: f32[64,32], index: 16, kind: input, shape index: {}]   ;;  %s4361_s17 = inlined_call_operand.vmem [shape: f32[1,32], index: 17, kind: input, shape index: {}]   ;;  %s4362_s18 = inlined_call_operand.vmem [shape: f32[3,32], index: 18, kind: input, shape index: {}]   ;;  %s4363_s19 = inlined_call_operand.vmem [shape: f32[3,32], index: 19, kind: input, shape index: {}]   ;;  %s4364_s20 = inlined_call_operand.hbm [shape: f32[16,32], index: 20, kind: output, shape index: {}]  }
   0x1   :  { %4370 = sst [smem:[#allocation5_spill]] %s4344_s0 }
   0x2   :  { %4371 = sst [smem:[#allocation6_spill]] %s4345_s1 }
   0x3   :  { %4372 = sst [smem:[#allocation7_spill]] %s4346_s2 }
   0x4   :  { %4373 = sst [smem:[#allocation8_spill]] %s4347_s3 }
   0x5   :  { %4374 = sst [smem:[#allocation9_spill]] %s4348_s4 }
   0x6   :  { %s4375_s23 = sld [smem:[#allocation5_spill]]  ;;  %vm74_vm0 = vcmask 261120  }
   0xc   :  { %v3807_v0 = vld [vmem:[%s4375_s23] sm:$0xff]  ;;  %v3812_v1 = vld [vmem:[%s4375_s23 + $0x8] sm:$0xff] }
   0xd   :  { %25 = vsyncpa [#allocation3], 0  ;;  %v75_v2 = vsel %vm74_vm0, %v3807_v0, 0.0  ;;  %v78_v3 = vsel %vm74_vm0, %v3812_v1, 0.0  ;;  %s4376_s26 = sld [smem:[#allocation9_spill]]  ;;  %v97_v25 = vlaneseq  ;;  %vm234_vm5 = vcmask 64512  }
   0xe   :  { %76 = vadd.xlane.f32.xlu0 %v75_v2  ;;  %v3840_v37 = vld [vmem:[%s4362_s18] sm:$0x7]  ;;  %s3685_s25 = smov 96   ;;  %s3686_s3 = smov 120   ;;  %vm318_vm6 = vcmask 130048   ;;  %vm2967_vm15 = vcmask 523264  }
   0xf   :  { %v3834_v32 = vshrl.u32 %v97_v25, 7  ;;  %v3846_v39 = vld [vmem:[%s4363_s19] sm:$0x7]  ;;  %s4377_s28 = sld [smem:[#allocation7_spill]]  ;;  %s3688_s30 = smov 64  }
  0x10   :  { %v3078_v49 = vld [vmem:[%s4349_s5] ss:$0 sm:$0xff]  ;;  %s3687_s5 = smov 88   ;;  %s3689_s0 = smov 56  }
  0x11   :  { %v99_v36 = vsub.s32 0, %v3834_v32  ;;  %s3690_s21 = smov 80   ;;  %s3691_s1 = smov 112  }
  0x12   :  { %79 = vadd.xlane.f32.xlu0 %v78_v3  ;;  %s3692_s22 = smov 72   ;;  %s3693_s23 = smov 104  }
  0x13   :  { %v132_v14 = vld [vmem:[%s4376_s26 + $0x18] sm:$0xff]  ;;  %v131_v15 = vld [vmem:[%s4376_s26 + $0x10] sm:$0xff]  ;;  %v130_v16 = vld [vmem:[%s4376_s26 + $0x8] sm:$0xff]  ;;  %v100_v38 = vrot.slane %v3840_v37, %v99_v36  ;;  %v126_v41 = vrot.slane %v3846_v39, %v99_v36  ;;  %s3695_s4 = smov 40   ;;  %s4379_s29 = sld [smem:[#allocation8_spill]] }
  0x14   :  { %3309 = vmatprep.subr.mxu0 %v132_v14  ;;  %v129_v17 = vld [vmem:[%s4376_s26] sm:$0xff]  ;;  %s4378_s26 = sld [smem:[#allocation6_spill]] }
  0x15   :  { %3310 = vmatpush3.msra.mxu0 %v132_v14  ;;  %v3887_v60 = vld [vmem:[%s4377_s28 + $0x8] sm:$0xff]  ;;  %v3892_v62 = vld [vmem:[%s4377_s28] sm:$0xff]  ;;  %s3694_s28 = smov 48  }
  0x16   :  { %3311 = vmatprep.subr.mxu0 %v131_v15 }
  0x17   :  { %3312 = vmatpush3.msra.mxu0 %v131_v15 }
  0x18   :  { %3313 = vmatprep.subr.mxu0 %v130_v16 }
  0x19   :  { %3314 = vmatpush3.msra.mxu0 %v130_v16 }
  0x1a   :  { %3315 = vmatprep.subr.mxu0 %v129_v17 }
  0x1b   :  { %3316 = vmatpush3.msra.mxu0 %v129_v17 }
  0x97   :  { %v77_v4 = vpop.xlane.xlu0 %76 }
  0x98   :  { %v82_v5 = vmul.f32 0.03125, %v77_v4 }
  0x9a   :  { %v84_v6 = vsub.f32 %v3807_v0, %v82_v5 }
  0x9b   :  { %v80_v7 = vpop.xlane.xlu0 %79 }
  0x9c   :  { %v83_v8 = vmul.f32 0.03125, %v80_v7  ;;  %v86_v9 = vmul.f32 %v84_v6, %v84_v6  ;;  %v101_v40 = vmul.f32 %v100_v38, %v84_v6 }
  0x9e   :  { %v85_v10 = vsub.f32 %v3812_v1, %v83_v8  ;;  %v88_v11 = vsel %vm74_vm0, %v86_v9, 0.0 }
  0x9f   :  { %89 = vadd.xlane.f32.xlu1 %v88_v11 }
  0xa0   :  { %v87_v12 = vmul.f32 %v85_v10, %v85_v10  ;;  %v102_v44 = vmul.f32 %v100_v38, %v85_v10 }
  0xa2   :  { %v91_v13 = vsel %vm74_vm0, %v87_v12, 0.0 }
  0xa3   :  { %92 = vadd.xlane.f32.xlu1 %v91_v13 }
 0x128   :  { %v90_v18 = vpop.xlane.xlu1 %89 }
 0x129   :  { %v95_v19 = vmul.f32 0.032258064, %v90_v18 }
 0x12b   :  { %3573 = vrsqrt.f32 %v95_v19  ;;  %vm105_vm1 = vcmp.eq.f32.partialorder %v95_v19, inf  ;;  %v108_v24 = vand.u32 2147483648, %v95_v19  ;;  %vm107_vm2 = vcmp.eq.f32.partialorder %v95_v19, 0.0 }
 0x12c   :  { %v93_v20 = vpop.xlane.xlu1 %92 }
 0x12d   :  { %v96_v21 = vmul.f32 0.032258064, %v93_v20 }
 0x12f   :  { %3575 = vrsqrt.f32 %v96_v21  ;;  %vm112_vm3 = vcmp.eq.f32.partialorder %v96_v21, inf  ;;  %v115_v31 = vand.u32 2147483648, %v96_v21  ;;  %vm114_vm4 = vcmp.eq.f32.partialorder %v96_v21, 0.0 }
 0x138   :  { %v3574_v22 = vpop.eup %3573 }
 0x139   :  { %v104_v23 = vmul.f32 %v3574_v22, %v95_v19 }
 0x13b   :  { %v106_v26 = vsel %vm105_vm1, %v95_v19, %v104_v23 }
 0x13c   :  { %v3576_v27 = vpop.eup %3575  ;;  %v109_v28 = vsel %vm107_vm2, %v108_v24, %v106_v26 }
 0x13d   :  { %v111_v29 = vmul.f32 %v3576_v27, %v96_v21  ;;  %v117_v30 = vadd.f32 1e-06, %v109_v28 }
 0x13f   :  { %v113_v33 = vsel %vm112_vm3, %v96_v21, %v111_v29  ;;  %3577 = vrcp.f32 %v117_v30 }
 0x140   :  { %v116_v34 = vsel %vm114_vm4, %v115_v31, %v113_v33 }
 0x141   :  { %v118_v35 = vadd.f32 1e-06, %v116_v34 }
 0x143   :  { %3579 = vrcp.f32 %v118_v35 }
 0x14c   :  { %v3578_v42 = vpop.eup %3577 }
 0x14d   :  { %v120_v43 = vmul.f32 %v3578_v42, %v101_v40 }
 0x14f   :  { %v127_v45 = vadd.f32 %v126_v41, %v120_v43 }
 0x150   :  { %v3580_v46 = vpop.eup %3579 }
 0x151   :  { %v122_v47 = vmul.f32 %v3580_v46, %v102_v44  ;;  %3317 = vmatprep.mubr.msk.f32.mxu0 %vm74_vm0, %v127_v45 }
 0x153   :  { %v128_v48 = vadd.f32 %v126_v41, %v122_v47 }
 0x155   :  { %3318 = vmatmul.mubr.msk.f32.vlgmr.msra.gmra.mxu0 %vm74_vm0, %v128_v48 }
 0x215   :  { %v3319_v50 = vpop.f32.mrf.mxu0 }
 0x216   :  { %v3854_v51 = vadd.f32 %v3319_v50, %v3078_v49 }
 0x217   :  { %v212_v52 = vpop.f32.mrf.mxu0 }
 0x218   :  { %v3856_v53 = vadd.f32 %v3078_v49, %v212_v52  ;;  %232 = vrot.lane.b32.xlu0 %v3854_v51, %s3685_s25  ;;  %v224_v52 = vld [vmem:[%s4350_s6 + $0x8] sm:$0xff] }
 0x21a   :  { %230 = vrot.lane.b32.xlu1 %v3856_v53, %s3685_s25  ;;  %3324 = vmatprep.mubr.msk.f32.mxu1 %vm234_vm5, %v3856_v53 }
 0x21c   :  { %428 = vrot.lane.b32.xlu0 %v3856_v53, %s3686_s3 }
 0x21e   :  { %434 = vrot.lane.b32.xlu1 %v3854_v51, %s3687_s5 }
 0x222   :  { %432 = vrot.lane.b32.xlu1 %v3856_v53, %s3687_s5 }
 0x226   :  { %430 = vrot.lane.b32.xlu1 %v3854_v51, %s3686_s3 }
 0x28a   :  { %v233_v54 = vpop.permute.xlu0 %232 }
 0x28b   :  { %3320 = vmatprep.subr.msk.mxu1 %vm234_vm5, %v233_v54 }
 0x28c   :  { %3321 = vmatpush3.xpose.msk.msra.mxu1 %vm234_vm5, %v233_v54  ;;  %v231_v55 = vpop.permute.xlu1 %230  ;;  %v223_v54 = vld [vmem:[%s4350_s6] sm:$0xff] }
 0x28d   :  { %3322 = vmatprep.subr.msk.mxu1 %vm234_vm5, %v231_v55 }
 0x28e   :  { %v429_v57 = vpop.permute.xlu0 %428 }
 0x290   :  { %3323 = vmatpush3.xpose.msk.msra.mxu1 %vm234_vm5, %v231_v55  ;;  %v435_v56 = vpop.permute.xlu1 %434 }
 0x291   :  { %3334 = vmatprep.subr.msk.mxu1 %vm234_vm5, %v435_v56 }
 0x293   :  { %3325 = vmatmul.mubr.msk.f32.vlgmr.msra.gmra.mxu1 %vm234_vm5, %v3854_v51 }
 0x294   :  { %v433_v58 = vpop.permute.xlu1 %432  ;;  %3335 = vmatpush3.xpose.msk.msra.mxu1 %vm234_vm5, %v435_v56  ;;  %3338 = vmatprep.mubr.msk.f32.mxu1 %vm234_vm5, %v429_v57 }
 0x295   :  { %3336 = vmatprep.subr.msk.mxu1 %vm234_vm5, %v433_v58 }
 0x298   :  { %3337 = vmatpush3.xpose.msk.msra.mxu1 %vm234_vm5, %v433_v58  ;;  %v431_v59 = vpop.permute.xlu1 %430 }
 0x29b   :  { %3339 = vmatmul.mubr.msk.f32.vlgmr.msra.gmra.mxu1 %vm234_vm5, %v431_v59 }
 0x353   :  { %v3326_v61 = vpop.f32.mrf.mxu1 }
 0x354   :  { %v315_v63 = vadd.f32 %v3326_v61, %v3887_v60 }
 0x355   :  { %v309_v2 = vpop.f32.mrf.mxu1 }
 0x356   :  { %v310_v3 = vadd.f32 %v309_v2, %v3892_v62  ;;  %v322_v4 = vsel %vm318_vm6, %v315_v63, -inf }
 0x357   :  { %323 = vmax.xlane.f32.xlu1 %v322_v4 }
 0x358   :  { %v319_v5 = vsel %vm318_vm6, %v310_v3, -inf }
 0x359   :  { %320 = vmax.xlane.f32.xlu0 %v319_v5 }
 0x35b   :  { %v3340_v6 = vpop.f32.mrf.mxu1 }
 0x35c   :  { %v516_v9 = vadd.f32 %v3340_v6, %v3887_v60 }
 0x35d   :  { %v510_v7 = vpop.f32.mrf.mxu1 }
 0x35e   :  { %v511_v8 = vadd.f32 %v510_v7, %v3892_v62  ;;  %v522_v11 = vsel %vm318_vm6, %v516_v9, -inf }
 0x360   :  { %v519_v10 = vsel %vm318_vm6, %v511_v8, -inf }
 0x361   :  { %520 = vmax.xlane.f32.xlu0 %v519_v10 }
 0x365   :  { %523 = vmax.xlane.f32.xlu0 %v522_v11 }
 0x3e0   :  { %v324_v12 = vpop.xlane.xlu1 %323 }
 0x3e1   :  { %v326_v13 = vsub.f32 %v315_v63, %v324_v12 }
 0x3e2   :  { %v321_v14 = vpop.xlane.xlu0 %320 }
 0x3e3   :  { %v329_v15 = vmul.f32 1.442695, %v326_v13  ;;  %v325_v16 = vsub.f32 %v310_v3, %v321_v14 }
 0x3e5   :  { %3581 = vpow2.f32 %v329_v15  ;;  %v327_v17 = vmul.f32 1.442695, %v325_v16 }
 0x3e7   :  { %3583 = vpow2.f32 %v327_v17 }
 0x3ea   :  { %v521_v18 = vpop.xlane.xlu0 %520 }
 0x3eb   :  { %v525_v19 = vsub.f32 %v511_v8, %v521_v18 }
 0x3ed   :  { %v527_v20 = vmul.f32 1.442695, %v525_v19 }
 0x3ee   :  { %v524_v21 = vpop.xlane.xlu0 %523 }
 0x3ef   :  { %3585 = vpow2.f32 %v527_v20  ;;  %v526_v22 = vsub.f32 %v516_v9, %v524_v21 }
 0x3f1   :  { %v529_v23 = vmul.f32 1.442695, %v526_v22 }
 0x3f2   :  { %v3582_v24 = vpop.eup %3581 }
 0x3f3   :  { %3587 = vpow2.f32 %v529_v23  ;;  %v334_v25 = vsel %vm318_vm6, %v3582_v24, 0.0 }
 0x3f4   :  { %v3584_v26 = vpop.eup %3583  ;;  %335 = vadd.xlane.f32.xlu1 %v334_v25 }
 0x3f5   :  { %v331_v27 = vsel %vm318_vm6, %v3584_v26, 0.0 }
 0x3f6   :  { %332 = vadd.xlane.f32.xlu0 %v331_v27 }
 0x3fc   :  { %v3586_v28 = vpop.eup %3585 }
 0x3fd   :  { %v531_v29 = vsel %vm318_vm6, %v3586_v28, 0.0 }
 0x3fe   :  { %532 = vadd.xlane.f32.xlu0 %v531_v29 }
 0x400   :  { %v3588_v30 = vpop.eup %3587 }
 0x401   :  { %v534_v31 = vsel %vm318_vm6, %v3588_v30, 0.0 }
 0x402   :  { %535 = vadd.xlane.f32.xlu1 %v534_v31 }
 0x413   :  { %341 = vrot.lane.b32.xlu1 %v3856_v53, %s3688_s30 }
 0x414   :  { %343 = vrot.lane.b32.xlu0 %v3854_v51, %s3688_s30 }
 0x417   :  { %543 = vrot.lane.b32.xlu1 %v3854_v51, %s3689_s0 }
 0x418   :  { %796 = vrot.lane.b32.xlu0 %v3854_v51, %s3690_s21 }
 0x41b   :  { %541 = vrot.lane.b32.xlu1 %v3856_v53, %s3689_s0 }
 0x41c   :  { %790 = vrot.lane.b32.xlu0 %v3856_v53, %s3691_s1 }
 0x41f   :  { %794 = vrot.lane.b32.xlu1 %v3856_v53, %s3690_s21 }
 0x420   :  { %1079 = vrot.lane.b32.xlu0 %v3854_v51, %s3692_s22 }
 0x423   :  { %792 = vrot.lane.b32.xlu1 %v3854_v51, %s3691_s1 }
 0x424   :  { %1073 = vrot.lane.b32.xlu0 %v3856_v53, %s3693_s23 }
 0x427   :  { %1077 = vrot.lane.b32.xlu1 %v3856_v53, %s3692_s22 }
 0x42b   :  { %1075 = vrot.lane.b32.xlu1 %v3854_v51, %s3693_s23 }
 0x47d   :  { %v336_v33 = vpop.xlane.xlu1 %335 }
 0x47e   :  { %3589 = vrcp.f32 %v336_v33 }
 0x47f   :  { %v333_v34 = vpop.xlane.xlu0 %332 }
 0x480   :  { %3591 = vrcp.f32 %v333_v34 }
 0x487   :  { %v533_v35 = vpop.xlane.xlu0 %532 }
 0x488   :  { %3593 = vrcp.f32 %v533_v35 }
 0x48b   :  { %v536_v36 = vpop.xlane.xlu1 %535  ;;  %v344_v38 = vpop.permute.xlu0 %343 }
 0x48c   :  { %v3590_v40 = vpop.eup %3589  ;;  %3595 = vrcp.f32 %v536_v36  ;;  %3327 = vmatprep.subr.mxu0 %v344_v38 }
 0x48d   :  { %v3592_v41 = vpop.eup %3591  ;;  %3328 = vmatpush3.msra.mxu0 %v344_v38  ;;  %v340_v44 = vmul.f32 %v3590_v40, %v3582_v24 }
 0x48e   :  { %v339_v42 = vmul.f32 %v3592_v41, %v3584_v26 }
 0x48f   :  { %v342_v43 = vpop.permute.xlu1 %341  ;;  %v797_v56 = vpop.permute.xlu0 %796 }
 0x490   :  { %3329 = vmatprep.subr.mxu0 %v342_v43  ;;  %3331 = vmatprep.mubr.msk.f32.mxu0 %vm318_vm6, %v339_v42 }
 0x491   :  { %3330 = vmatpush3.msra.mxu0 %v342_v43 }
 0x492   :  { %3332 = vmatmul.mubr.msk.f32.vlgmr.msra.gmra.mxu0 %vm318_vm6, %v340_v44 }
 0x493   :  { %v544_v45 = vpop.permute.xlu1 %543  ;;  %v791_v61 = vpop.permute.xlu0 %790 }
 0x494   :  { %3341 = vmatprep.subr.mxu0 %v544_v45 }
 0x495   :  { %v3594_v46 = vpop.eup %3593  ;;  %3342 = vmatpush3.msra.mxu0 %v544_v45 }
 0x496   :  { %v539_v47 = vmul.f32 %v3594_v46, %v3586_v28 }
 0x497   :  { %v542_v48 = vpop.permute.xlu1 %541  ;;  %v1080_v2 = vpop.permute.xlu0 %1079 }
 0x498   :  { %3343 = vmatprep.subr.mxu0 %v542_v48  ;;  %3345 = vmatprep.mubr.msk.f32.mxu0 %vm318_vm6, %v539_v47 }
 0x499   :  { %v3596_v49 = vpop.eup %3595  ;;  %3344 = vmatpush3.msra.mxu0 %v542_v48 }
 0x49a   :  { %v540_v50 = vmul.f32 %v3596_v49, %v3588_v30  ;;  %3348 = vmatprep.subr.mxu0 %v224_v52 }
 0x49b   :  { %v795_v63 = vpop.permute.xlu1 %794  ;;  %v1074_v4 = vpop.permute.xlu0 %1073 }
 0x49c   :  { %3346 = vmatmul.mubr.msk.f32.vlgmr.msra.gmra.mxu0 %vm318_vm6, %v540_v50 }
 0x49d   :  { %3349 = vmatpush3.msra.mxu0 %v224_v52 }
 0x49e   :  { %3353 = vmatprep.subr.mxu0 %v223_v54 }
 0x49f   :  { %v793_v3 = vpop.permute.xlu1 %792 }
 0x4a3   :  { %v1078_v5 = vpop.permute.xlu1 %1077 }
 0x4a7   :  { %v1076_v6 = vpop.permute.xlu1 %1075 }
 0x552   :  { %v3333_v55 = vpop.f32.mrf.mxu0 }
 0x554   :  { %v419_v57 = vpop.f32.mrf.mxu0 }
 0x55c   :  { %v3347_v58 = vpop.f32.mrf.mxu0 }
 0x55e   :  { %v619_v59 = vpop.f32.mrf.mxu0 }
 0x55f   :  { %3350 = vmatprep.mubr.msk.f32.mxu0 %vm234_vm5, %v619_v59 }
 0x560   :  { %3351 = vmatmul.mubr.msk.f32.vlgmr.msra.gmra.mxu0 %vm234_vm5, %v3347_v58 }
 0x561   :  { %3354 = vmatpush3.msra.mxu0 %v223_v54  ;;  %3355 = vmatprep.mubr.msk.f32.mxu0 %vm234_vm5, %v419_v57 }
 0x562   :  { %3358 = vmatprep.subr.msk.mxu0 %vm234_vm5, %v797_v56 }
 0x564   :  { %3356 = vmatmul.mubr.msk.f32.vlgmr.msra.gmra.mxu0 %vm234_vm5, %v3333_v55 }
 0x565   :  { %3359 = vmatpush3.xpose.msk.msra.mxu0 %vm234_vm5, %v797_v56  ;;  %3362 = vmatprep.mubr.msk.f32.mxu0 %vm234_vm5, %v791_v61 }
 0x566   :  { %3360 = vmatprep.subr.msk.mxu0 %vm234_vm5, %v795_v63 }
 0x569   :  { %3361 = vmatpush3.xpose.msk.msra.mxu0 %vm234_vm5, %v795_v63 }
 0x56a   :  { %3377 = vmatprep.subr.msk.mxu0 %vm234_vm5, %v1080_v2 }
 0x56c   :  { %3363 = vmatmul.mubr.msk.f32.vlgmr.msra.gmra.mxu0 %vm234_vm5, %v793_v3 }
 0x56d   :  { %3378 = vmatpush3.xpose.msk.msra.mxu0 %vm234_vm5, %v1080_v2  ;;  %3381 = vmatprep.mubr.msk.f32.mxu0 %vm234_vm5, %v1074_v4 }
 0x56e   :  { %3379 = vmatprep.subr.msk.mxu0 %vm234_vm5, %v1078_v5 }
 0x571   :  { %3380 = vmatpush3.xpose.msk.msra.mxu0 %vm234_vm5, %v1078_v5 }
 0x574   :  { %3382 = vmatmul.mubr.msk.f32.vlgmr.msra.gmra.mxu0 %vm234_vm5, %v1076_v6 }
 0x620   :  { %v3352_v7 = vpop.f32.mrf.mxu0 }
 0x622   :  { %v700_v8 = vpop.f32.mrf.mxu0 }
 0x624   :  { %v3357_v9 = vpop.f32.mrf.mxu0 }
 0x625   :  { %v3952_v10 = vadd.f32 %v3357_v9, %v3352_v7 }
 0x626   :  { %v781_v11 = vpop.f32.mrf.mxu0 }
 0x627   :  { %v3954_v12 = vadd.f32 %v781_v11, %v700_v8 }
 0x62c   :  { %v3364_v13 = vpop.f32.mrf.mxu0 }
 0x62d   :  { %v878_v14 = vadd.f32 %v3364_v13, %v3887_v60 }
 0x62e   :  { %v872_v15 = vpop.f32.mrf.mxu0 }
 0x62f   :  { %v873_v16 = vadd.f32 %v872_v15, %v3892_v62  ;;  %v884_v17 = vsel %vm318_vm6, %v878_v14, -inf }
 0x630   :  { %885 = vmax.xlane.f32.xlu1 %v884_v17 }
 0x631   :  { %v881_v18 = vsel %vm318_vm6, %v873_v16, -inf }
 0x632   :  { %882 = vmax.xlane.f32.xlu0 %v881_v18 }
 0x634   :  { %v3383_v19 = vpop.f32.mrf.mxu0 }
 0x635   :  { %v1161_v38 = vadd.f32 %v3383_v19, %v3887_v60  ;;  %v225_v60 = vld [vmem:[%s4350_s6 + $0x10] sm:$0xff] }
 0x636   :  { %v1155_v20 = vpop.f32.mrf.mxu0 }
 0x637   :  { %v1156_v21 = vadd.f32 %v1155_v20, %v3892_v62  ;;  %v1167_v40 = vsel %vm318_vm6, %v1161_v38, -inf }
 0x639   :  { %v1164_v22 = vsel %vm318_vm6, %v1156_v21, -inf }
 0x641   :  { %903 = vrot.lane.b32.xlu1 %v3856_v53, %s3694_s28 }
 0x665   :  { %1165 = vmax.xlane.f32.xlu1 %v1164_v22 }
 0x6b9   :  { %v886_v23 = vpop.xlane.xlu1 %885 }
 0x6ba   :  { %v888_v24 = vsub.f32 %v878_v14, %v886_v23  ;;  %v3113_v14 = vld [vmem:[%s4351_s7] ss:$0 sm:$0xff] }
 0x6bb   :  { %v883_v25 = vpop.xlane.xlu0 %882 }
 0x6bc   :  { %v891_v26 = vmul.f32 1.442695, %v888_v24  ;;  %v887_v27 = vsub.f32 %v873_v16, %v883_v25 }
 0x6bd   :  { %v904_v62 = vpop.permute.xlu1 %903 }
 0x6be   :  { %3597 = vpow2.f32 %v891_v26  ;;  %v889_v28 = vmul.f32 1.442695, %v887_v27 }
 0x6c0   :  { %3599 = vpow2.f32 %v889_v28 }
 0x6cb   :  { %v3598_v29 = vpop.eup %3597 }
 0x6cc   :  { %v896_v30 = vsel %vm318_vm6, %v3598_v29, 0.0 }
 0x6cd   :  { %v3600_v31 = vpop.eup %3599  ;;  %897 = vadd.xlane.f32.xlu0 %v896_v30 }
 0x6ce   :  { %v893_v33 = vsel %vm318_vm6, %v3600_v31, 0.0 }
 0x6d1   :  { %894 = vadd.xlane.f32.xlu0 %v893_v33  ;;  %v1512_v33 = vld [vmem:[%s4354_s10 + $0x10] sm:$0xff] }
 0x6e7   :  { %905 = vrot.lane.b32.xlu0 %v3854_v51, %s3694_s28 }
 0x6ee   :  { %v1166_v34 = vpop.xlane.xlu1 %1165 }
 0x6ef   :  { %v1170_v35 = vsub.f32 %v1156_v21, %v1166_v34  ;;  %v1510_v34 = vld [vmem:[%s4354_s10] sm:$0xff] }
 0x6f1   :  { %v1172_v36 = vmul.f32 1.442695, %v1170_v35  ;;  %v68_v35 = vld [vmem:[%s4378_s26] sm:$0xff] }
 0x6f3   :  { %3601 = vpow2.f32 %v1172_v36  ;;  %v69_v36 = vld [vmem:[%s4378_s26 + $0x8] sm:$0xff] }
 0x700   :  { %v3602_v41 = vpop.eup %3601 }
 0x701   :  { %v1176_v42 = vsel %vm318_vm6, %v3602_v41, 0.0 }
 0x706   :  { %1168 = vmax.xlane.f32.xlu0 %v1167_v40  ;;  %v71_v40 = vld [vmem:[%s4378_s26 + $0x18] sm:$0xff] }
 0x70a   :  { %1177 = vadd.xlane.f32.xlu0 %v1176_v42  ;;  %v1420_v42 = vld [vmem:[%s4352_s8 + $0x10] sm:$0xff] }
 0x720   :  { %1188 = vrot.lane.b32.xlu0 %v3854_v51, %s3695_s4 }
 0x756   :  { %v898_v43 = vpop.xlane.xlu0 %897 }
 0x757   :  { %3603 = vrcp.f32 %v898_v43  ;;  %v1419_v43 = vld [vmem:[%s4352_s8 + $0x8] sm:$0xff] }
 0x75a   :  { %v895_v44 = vpop.xlane.xlu0 %894 }
 0x75b   :  { %3605 = vrcp.f32 %v895_v44  ;;  %v1418_v44 = vld [vmem:[%s4352_s8] sm:$0xff] }
 0x75e   :  { %v906_v45 = vpop.permute.xlu0 %905 }
 0x75f   :  { %3365 = vmatprep.subr.mxu1 %v906_v45 }
 0x760   :  { %3366 = vmatpush3.msra.mxu1 %v906_v45 }
 0x761   :  { %3367 = vmatprep.subr.mxu1 %v904_v62 }
 0x762   :  { %3368 = vmatpush3.msra.mxu1 %v904_v62  ;;  %v1511_v62 = vld [vmem:[%s4354_s10 + $0x8] sm:$0xff] }
 0x763   :  { %3372 = vmatprep.subr.mxu1 %v225_v60 }
 0x764   :  { %v3604_v46 = vpop.eup %3603 }
 0x765   :  { %v902_v49 = vmul.f32 %v3604_v46, %v3598_v29 }
 0x768   :  { %v3606_v47 = vpop.eup %3605 }
 0x769   :  { %v901_v48 = vmul.f32 %v3606_v47, %v3600_v31  ;;  %v1513_v31 = vld [vmem:[%s4354_s10 + $0x18] sm:$0xff] }
 0x76b   :  { %3369 = vmatprep.mubr.msk.f32.mxu1 %vm318_vm6, %v901_v48 }
 0x76c   :  { %3370 = vmatmul.mubr.msk.f32.vlgmr.msra.gmra.mxu1 %vm318_vm6, %v902_v49 }
 0x76d   :  { %3373 = vmatpush3.msra.mxu1 %v225_v60 }
 0x78f   :  { %v1169_v51 = vpop.xlane.xlu0 %1168 }
 0x790   :  { %v1171_v50 = vsub.f32 %v1161_v38, %v1169_v51  ;;  %v70_v38 = vld [vmem:[%s4378_s26 + $0x10] sm:$0xff] }
 0x792   :  { %v1174_v52 = vmul.f32 1.442695, %v1171_v50 }
 0x793   :  { %v1178_v54 = vpop.xlane.xlu0 %1177 }
 0x794   :  { %3607 = vpow2.f32 %v1174_v52 }
 0x795   :  { %3609 = vrcp.f32 %v1178_v54 }
 0x797   :  { %v1189_v55 = vpop.permute.xlu0 %1188 }
 0x798   :  { %3384 = vmatprep.subr.mxu1 %v1189_v55 }
 0x7a1   :  { %v3608_v56 = vpop.eup %3607 }
 0x7a2   :  { %v1179_v57 = vsel %vm318_vm6, %v3608_v56, 0.0  ;;  %v3610_v58 = vpop.eup %3609 }
 0x7a3   :  { %1180 = vadd.xlane.f32.xlu1 %v1179_v57  ;;  %v1184_v2 = vmul.f32 %v3610_v58, %v3602_v41  ;;  %v1421_v41 = vld [vmem:[%s4352_s8 + $0x18] sm:$0xff] }
 0x7a4   :  { %3396 = vmatprep.subr.mxu0 %v1421_v41 }
 0x7a5   :  { %3397 = vmatpush3.msra.mxu0 %v1421_v41 }
 0x7a6   :  { %3398 = vmatprep.subr.mxu0 %v1420_v42 }
 0x7a7   :  { %3399 = vmatpush3.msra.mxu0 %v1420_v42 }
 0x7a8   :  { %3400 = vmatprep.subr.mxu0 %v1419_v43 }
 0x7a9   :  { %3401 = vmatpush3.msra.mxu0 %v1419_v43 }
 0x7aa   :  { %3402 = vmatprep.subr.mxu0 %v1418_v44 }
 0x7ab   :  { %3403 = vmatpush3.msra.mxu0 %v1418_v44 }
 0x7b4   :  { %1186 = vrot.lane.b32.xlu1 %v3856_v53, %s3695_s4  ;;  %v226_v53 = vld [vmem:[%s4350_s6 + $0x18] sm:$0xff] }
 0x82c   :  { %v3371_v59 = vpop.f32.mrf.mxu1  ;;  %v1181_v61 = vpop.xlane.xlu1 %1180 }
 0x82d   :  { %3611 = vrcp.f32 %v1181_v61 }
 0x82e   :  { %v981_v63 = vpop.f32.mrf.mxu1 }
 0x82f   :  { %3374 = vmatprep.mubr.msk.f32.mxu1 %vm234_vm5, %v981_v63  ;;  %v1388_v63 = vsub.s32 1, %v3834_v32 }
 0x830   :  { %3375 = vmatmul.mubr.msk.f32.vlgmr.msra.gmra.mxu1 %vm234_vm5, %v3371_v59  ;;  %v1187_v3 = vpop.permute.xlu1 %1186 }
 0x831   :  { %3385 = vmatpush3.msra.mxu1 %v1189_v55  ;;  %3388 = vmatprep.mubr.msk.f32.mxu1 %vm318_vm6, %v1184_v2  ;;  %v1389_v2 = vrot.slane %v3840_v37, %v1388_v63  ;;  %v3117_v37 = vld [vmem:[%s4355_s11] ss:$0 sm:$0xff] }
 0x832   :  { %3386 = vmatprep.subr.mxu1 %v1187_v3 }
 0x833   :  { %3387 = vmatpush3.msra.mxu1 %v1187_v3 }
 0x834   :  { %3391 = vmatprep.subr.mxu1 %v226_v53 }
 0x83a   :  { %v3612_v4 = vpop.eup %3611 }
 0x83b   :  { %v1185_v5 = vmul.f32 %v3612_v4, %v3608_v56 }
 0x83d   :  { %3389 = vmatmul.mubr.msk.f32.vlgmr.msra.gmra.mxu1 %vm318_vm6, %v1185_v5 }
 0x83e   :  { %3392 = vmatpush3.msra.mxu1 %v226_v53 }
 0x83f   :  { %3407 = vmatprep.subr.mxu1 %v1513_v31 }
 0x8f0   :  { %v3376_v6 = vpop.f32.mrf.mxu1 }
 0x8f1   :  { %v1072_v7 = vadd.f32 %v3376_v6, %v3952_v10  ;;  %v1415_v6 = vrot.slane %v3846_v39, %v1388_v63 }
 0x8f2   :  { %v1062_v8 = vpop.f32.mrf.mxu1 }
 0x8f3   :  { %v1071_v9 = vadd.f32 %v1062_v8, %v3954_v12 }
 0x8fd   :  { %v3390_v11 = vpop.f32.mrf.mxu1 }
 0x8ff   :  { %v1264_v13 = vpop.f32.mrf.mxu1 }
 0x900   :  { %3393 = vmatprep.mubr.msk.f32.mxu1 %vm234_vm5, %v1264_v13 }
 0x901   :  { %3394 = vmatmul.mubr.msk.f32.vlgmr.msra.gmra.mxu1 %vm234_vm5, %v3390_v11 }
 0x902   :  { %3408 = vmatpush3.msra.mxu1 %v1513_v31  ;;  %3415 = vmatprep.mubr.msk.f32.mxu1 %vm74_vm0, %v68_v35 }
 0x903   :  { %3409 = vmatprep.subr.mxu1 %v1512_v33 }
 0x904   :  { %3410 = vmatpush3.msra.mxu1 %v1512_v33 }
 0x905   :  { %3411 = vmatprep.subr.mxu1 %v1511_v62 }
 0x906   :  { %3412 = vmatpush3.msra.mxu1 %v1511_v62 }
 0x907   :  { %3413 = vmatprep.subr.mxu1 %v1510_v34 }
 0x908   :  { %3414 = vmatpush3.msra.mxu1 %v1510_v34 }
 0x909   :  { %3416 = vmatmul.mubr.msk.f32.vlgmr.msra.gmra.mxu1 %vm74_vm0, %v69_v36 }
 0x90a   :  { %3418 = vmatprep.mubr.msk.f32.mxu1 %vm74_vm0, %v70_v38 }
 0x90d   :  { %3419 = vmatmul.mubr.msk.f32.gmra.mxu1 %vm74_vm0, %v71_v40 }
 0x9c1   :  { %v3395_v15 = vpop.f32.mrf.mxu1 }
 0x9c2   :  { %v1355_v16 = vadd.f32 %v3395_v15, %v1072_v7 }
 0x9c3   :  { %v1345_v17 = vpop.f32.mrf.mxu1 }
 0x9c4   :  { %v1363_v18 = vadd.f32 %v3113_v14, %v1355_v16  ;;  %v1354_v19 = vadd.f32 %v1345_v17, %v1071_v9 }
 0x9c6   :  { %v3992_v10 = vadd.f32 %v1363_v18, %v3812_v1  ;;  %v1362_v20 = vadd.f32 %v3113_v14, %v1354_v19 }
 0x9c8   :  { %v3995_v12 = vadd.f32 %v1362_v20, %v3807_v0  ;;  %v1369_v21 = vsel %vm74_vm0, %v3992_v10, 0.0 }
 0x9c9   :  { %1370 = vadd.xlane.f32.xlu0 %v1369_v21  ;;  %v3417_v13 = vpop.f32.mrf.mxu1  ;;  %v3114_v21 = vld [vmem:[%s4353_s9] ss:$0 sm:$0xff] }
 0x9ca   :  { %v1366_v22 = vsel %vm74_vm0, %v3995_v12, 0.0  ;;  %v4071_v18 = vadd.f32 %v3417_v13, %v3117_v37 }
 0x9cb   :  { %1367 = vadd.xlane.f32.xlu1 %v1366_v22  ;;  %v1599_v14 = vpop.f32.mrf.mxu1 }
 0x9cc   :  { %v4077_v19 = vadd.f32 %v3117_v37, %v1599_v14 }
 0x9cd   :  { %v3420_v15 = vpop.f32.mrf.mxu1 }
 0x9ce   :  { %v4063_v16 = vadd.f32 %v3420_v15, %v3117_v37 }
 0x9cf   :  { %v1609_v17 = vpop.f32.mrf.mxu1 }
 0x9d0   :  { %3421 = vmatprep.subr.msk.mxu0 %vm234_vm5, %v4063_v16  ;;  %v4067_v39 = vadd.f32 %v3117_v37, %v1609_v17 }
 0xa52   :  { %v1371_v23 = vpop.xlane.xlu0 %1370 }
 0xa53   :  { %v1373_v24 = vmul.f32 0.03125, %v1371_v23 }
 0xa54   :  { %v1368_v25 = vpop.xlane.xlu1 %1367 }
 0xa55   :  { %v4002_v26 = vsub.f32 %v3992_v10, %v1373_v24  ;;  %v1372_v1 = vmul.f32 0.03125, %v1368_v25  ;;  %v4101_v25 = vld [vmem:[%s4379_s29 + $0x8] sm:$0xff] }
 0xa57   :  { %v4005_v27 = vsub.f32 %v3995_v12, %v1372_v1  ;;  %v1377_v0 = vmul.f32 %v4002_v26, %v4002_v26  ;;  %v1391_v4 = vmul.f32 %v1389_v2, %v4002_v26  ;;  %v4106_v1 = vld [vmem:[%s4379_s29] sm:$0xff] }
 0xa59   :  { %v1381_v28 = vsel %vm74_vm0, %v1377_v0, 0.0  ;;  %v1376_v29 = vmul.f32 %v4005_v27, %v4005_v27  ;;  %v1390_v5 = vmul.f32 %v1389_v2, %v4005_v27 }
 0xa5a   :  { %1382 = vadd.xlane.f32.xlu1 %v1381_v28 }
 0xa5b   :  { %v1378_v30 = vsel %vm74_vm0, %v1376_v29, 0.0 }
 0xa5c   :  { %1379 = vadd.xlane.f32.xlu0 %v1378_v30 }
 0xae3   :  { %v1383_v45 = vpop.xlane.xlu1 %1382 }
 0xae4   :  { %v1385_v60 = vmul.f32 0.032258064, %v1383_v45 }
 0xae5   :  { %v1380_v46 = vpop.xlane.xlu0 %1379 }
 0xae6   :  { %3613 = vrsqrt.f32 %v1385_v60  ;;  %v1384_v47 = vmul.f32 0.032258064, %v1380_v46  ;;  %vm1401_vm7 = vcmp.eq.f32.partialorder %v1385_v60, inf  ;;  %v1404_v51 = vand.u32 2147483648, %v1385_v60 }
 0xae7   :  { %vm1403_vm8 = vcmp.eq.f32.partialorder %v1385_v60, 0.0 }
 0xae8   :  { %3615 = vrsqrt.f32 %v1384_v47  ;;  %vm1394_vm9 = vcmp.eq.f32.partialorder %v1384_v47, inf  ;;  %v1397_v57 = vand.u32 2147483648, %v1384_v47  ;;  %vm1396_vm10 = vcmp.eq.f32.partialorder %v1384_v47, 0.0 }
 0xaf3   :  { %v3614_v48 = vpop.eup %3613 }
 0xaf4   :  { %v1400_v49 = vmul.f32 %v3614_v48, %v1385_v60 }
 0xaf5   :  { %v3616_v50 = vpop.eup %3615 }
 0xaf6   :  { %v1402_v52 = vsel %vm1401_vm7, %v1385_v60, %v1400_v49  ;;  %v1393_v55 = vmul.f32 %v3616_v50, %v1384_v47 }
 0xaf7   :  { %v1405_v54 = vsel %vm1403_vm8, %v1404_v51, %v1402_v52 }
 0xaf8   :  { %v1407_v56 = vadd.f32 1e-06, %v1405_v54  ;;  %v1395_v58 = vsel %vm1394_vm9, %v1384_v47, %v1393_v55 }
 0xaf9   :  { %v1398_v59 = vsel %vm1396_vm10, %v1397_v57, %v1395_v58 }
 0xafa   :  { %3617 = vrcp.f32 %v1407_v56  ;;  %v1406_v61 = vadd.f32 1e-06, %v1398_v59  ;;  %v1620_v59 = vld [vmem:[%s4356_s12] sm:$0xff] }
 0xafc   :  { %3619 = vrcp.f32 %v1406_v61 }
 0xb07   :  { %v3618_v3 = vpop.eup %3617 }
 0xb08   :  { %v1411_v7 = vmul.f32 %v3618_v3, %v1391_v4 }
 0xb09   :  { %v3620_v53 = vpop.eup %3619 }
 0xb0a   :  { %v1409_v8 = vmul.f32 %v3620_v53, %v1390_v5  ;;  %v1417_v11 = vadd.f32 %v1415_v6, %v1411_v7 }
 0xb0c   :  { %v1416_v9 = vadd.f32 %v1415_v6, %v1409_v8 }
 0xb0e   :  { %3404 = vmatprep.mubr.msk.f32.mxu0 %vm74_vm0, %v1416_v9 }
 0xb0f   :  { %3405 = vmatmul.mubr.msk.f32.vlgmr.msra.gmra.mxu0 %vm74_vm0, %v1417_v11 }
 0xb10   :  { %3422 = vmatpush3.xpose.msk.msra.mxu0 %vm234_vm5, %v4063_v16 }
 0xb11   :  { %3423 = vmatprep.subr.msk.mxu0 %vm234_vm5, %v4067_v39 }
 0xb14   :  { %3424 = vmatpush3.xpose.msk.msra.mxu0 %vm234_vm5, %v4067_v39 }
 0xb15   :  { %3425 = vmatprep.subr.msk.mxu0 %vm234_vm5, %v4071_v18 }
 0xb18   :  { %3426 = vmatpush3.xpose.msk.msra.mxu0 %vm234_vm5, %v4071_v18 }
 0xb19   :  { %3427 = vmatprep.subr.msk.mxu0 %vm234_vm5, %v4077_v19 }
 0xb1c   :  { %3428 = vmatpush3.xpose.msk.msra.mxu0 %vm234_vm5, %v4077_v19 }
 0xbcf   :  { %v3406_v20 = vpop.f32.mrf.mxu0 }
 0xbd0   :  { %v4092_v24 = vadd.f32 %v3406_v20, %v3114_v21 }
 0xbd1   :  { %v1501_v22 = vpop.f32.mrf.mxu0 }
 0xbd2   :  { %v4090_v23 = vadd.f32 %v3114_v21, %v1501_v22 }
 0xbd4   :  { %3429 = vmatprep.mubr.msk.f32.mxu0 %vm234_vm5, %v4090_v23 }
 0xbd5   :  { %3430 = vmatmul.mubr.msk.f32.vlgmr.msra.gmra.mxu0 %vm234_vm5, %v4092_v24 }
 0xc95   :  { %v3431_v26 = vpop.f32.mrf.mxu0 }
 0xc96   :  { %v1715_v27 = vadd.f32 %v3431_v26, %v4101_v25 }
 0xc97   :  { %v1709_v0 = vpop.f32.mrf.mxu0 }
 0xc98   :  { %v1710_v28 = vadd.f32 %v1709_v0, %v4106_v1  ;;  %v1721_v29 = vsel %vm74_vm0, %v1715_v27, -inf }
 0xc99   :  { %1722 = vmax.xlane.f32.xlu1 %v1721_v29  ;;  %v1621_v29 = vld [vmem:[%s4356_s12 + $0x8] sm:$0xff] }
 0xc9a   :  { %v1718_v30 = vsel %vm74_vm0, %v1710_v28, -inf }
 0xc9b   :  { %1719 = vmax.xlane.f32.xlu0 %v1718_v30 }
 0xcaa   :  { %1744 = vrot.lane.b32.xlu1 %v4067_v39, %s3685_s25 }
 0xcae   :  { %1742 = vrot.lane.b32.xlu1 %v4071_v18, %s3685_s25 }
 0xcb1   :  { %1746 = vrot.lane.b32.xlu0 %v4063_v16, %s3685_s25 }
 0xcb2   :  { %1740 = vrot.lane.b32.xlu1 %v4077_v19, %s3685_s25 }
 0xd22   :  { %v1723_v31 = vpop.xlane.xlu1 %1722 }
 0xd23   :  { %v1725_v33 = vsub.f32 %v1715_v27, %v1723_v31 }
 0xd24   :  { %v1720_v62 = vpop.xlane.xlu0 %1719 }
 0xd25   :  { %v1728_v34 = vmul.f32 1.442695, %v1725_v33  ;;  %v1724_v35 = vsub.f32 %v1710_v28, %v1720_v62 }
 0xd26   :  { %v1745_v36 = vpop.permute.xlu1 %1744 }
 0xd27   :  { %3621 = vpow2.f32 %v1728_v34  ;;  %v1726_v38 = vmul.f32 1.442695, %v1724_v35 }
 0xd28   :  { %v1747_v40 = vpop.permute.xlu0 %1746 }
 0xd29   :  { %3623 = vpow2.f32 %v1726_v38  ;;  %3432 = vmatprep.subr.mxu1 %v1747_v40 }
 0xd2a   :  { %v1743_v41 = vpop.permute.xlu1 %1742  ;;  %3433 = vmatpush3.msra.mxu1 %v1747_v40 }
 0xd2b   :  { %3434 = vmatprep.subr.mxu1 %v1745_v36 }
 0xd2c   :  { %3435 = vmatpush3.msra.mxu1 %v1745_v36 }
 0xd2d   :  { %3436 = vmatprep.subr.mxu1 %v1743_v41 }
 0xd2e   :  { %v1741_v42 = vpop.permute.xlu1 %1740  ;;  %3437 = vmatpush3.msra.mxu1 %v1743_v41 }
 0xd2f   :  { %3438 = vmatprep.subr.mxu1 %v1741_v42 }
 0xd30   :  { %3439 = vmatpush3.msra.mxu1 %v1741_v42 }
 0xd34   :  { %v3622_v43 = vpop.eup %3621 }
 0xd35   :  { %v1733_v44 = vsel %vm74_vm0, %v3622_v43, 0.0 }
 0xd36   :  { %v3624_v45 = vpop.eup %3623  ;;  %1734 = vadd.xlane.f32.xlu1 %v1733_v44 }
 0xd37   :  { %v1730_v60 = vsel %vm74_vm0, %v3624_v45, 0.0 }
 0xd38   :  { %1731 = vadd.xlane.f32.xlu0 %v1730_v60 }
 0xd47   :  { %1841 = vrot.lane.b32.xlu1 %v4067_v39, %s3686_s3 }
 0xd4b   :  { %1837 = vrot.lane.b32.xlu1 %v4077_v19, %s3686_s3 }
 0xd4e   :  { %1843 = vrot.lane.b32.xlu0 %v4063_v16, %s3686_s3 }
 0xd4f   :  { %1835 = vrot.lane.b32.xlu1 %v4092_v24, %s3686_s3 }
 0xd52   :  { %1839 = vrot.lane.b32.xlu0 %v4071_v18, %s3686_s3 }
 0xd56   :  { %1833 = vrot.lane.b32.xlu0 %v4090_v23, %s3686_s3 }
 0xdbf   :  { %v1735_v46 = vpop.xlane.xlu1 %1734 }
 0xdc0   :  { %3625 = vrcp.f32 %v1735_v46 }
 0xdc1   :  { %v1732_v47 = vpop.xlane.xlu0 %1731 }
 0xdc2   :  { %3627 = vrcp.f32 %v1732_v47 }
 0xdc3   :  { %v1842_v56 = vpop.permute.xlu1 %1841 }
 0xdc5   :  { %v1844_v48 = vpop.permute.xlu0 %1843 }
 0xdc6   :  { %3443 = vmatprep.subr.msk.mxu1 %vm234_vm5, %v1844_v48 }
 0xdc7   :  { %v1838_v57 = vpop.permute.xlu1 %1837 }
 0xdc9   :  { %v1840_v49 = vpop.permute.xlu0 %1839 }
 0xdcb   :  { %v1836_v58 = vpop.permute.xlu1 %1835 }
 0xdcd   :  { %v3626_v51 = vpop.eup %3625  ;;  %v1834_v55 = vpop.permute.xlu0 %1833 }
 0xdce   :  { %v1739_v54 = vmul.f32 %v3626_v51, %v3622_v43 }
 0xdcf   :  { %v3628_v50 = vpop.eup %3627 }
 0xdd0   :  { %v1738_v52 = vmul.f32 %v3628_v50, %v3624_v45 }
 0xdd2   :  { %3440 = vmatprep.mubr.msk.f32.mxu1 %vm74_vm0, %v1738_v52 }
 0xdd3   :  { %3441 = vmatmul.mubr.msk.f32.vlgmr.msra.gmra.mxu1 %vm74_vm0, %v1739_v54 }
 0xdd4   :  { %3444 = vmatpush3.xpose.msk.msra.mxu1 %vm234_vm5, %v1844_v48  ;;  %3451 = vmatprep.mubr.msk.f32.mxu1 %vm234_vm5, %v1834_v55 }
 0xdd5   :  { %3445 = vmatprep.subr.msk.mxu1 %vm234_vm5, %v1842_v56 }
 0xdd8   :  { %3446 = vmatpush3.xpose.msk.msra.mxu1 %vm234_vm5, %v1842_v56 }
 0xdd9   :  { %3447 = vmatprep.subr.msk.mxu1 %vm234_vm5, %v1840_v49 }
 0xddc   :  { %3448 = vmatpush3.xpose.msk.msra.mxu1 %vm234_vm5, %v1840_v49 }
 0xddd   :  { %3449 = vmatprep.subr.msk.mxu1 %vm234_vm5, %v1838_v57 }
 0xde0   :  { %3450 = vmatpush3.xpose.msk.msra.mxu1 %vm234_vm5, %v1838_v57 }
 0xde1   :  { %3470 = vmatprep.subr.mxu1 %v1620_v59 }
 0xde3   :  { %3452 = vmatmul.mubr.msk.f32.vlgmr.msra.gmra.mxu1 %vm234_vm5, %v1836_v58 }
 0xde4   :  { %3471 = vmatpush3.msra.mxu1 %v1620_v59 }
 0xe93   :  { %v3442_v61 = vpop.f32.mrf.mxu1 }
 0xe95   :  { %v1824_v63 = vpop.f32.mrf.mxu1 }
 0xe96   :  { %3472 = vmatprep.mubr.msk.f32.mxu1 %vm234_vm5, %v1824_v63 }
 0xe97   :  { %3473 = vmatmul.mubr.msk.f32.vlgmr.msra.gmra.mxu1 %vm234_vm5, %v3442_v61 }
 0xea3   :  { %v3453_v2 = vpop.f32.mrf.mxu1 }
 0xea4   :  { %v1929_v3 = vadd.f32 %v3453_v2, %v4101_v25 }
 0xea5   :  { %v1923_v4 = vpop.f32.mrf.mxu1 }
 0xea6   :  { %v1924_v5 = vadd.f32 %v1923_v4, %v4106_v1  ;;  %v1935_v53 = vsel %vm74_vm0, %v1929_v3, -inf }
 0xea7   :  { %1936 = vmax.xlane.f32.xlu1 %v1935_v53 }
 0xea8   :  { %v1932_v6 = vsel %vm74_vm0, %v1924_v5, -inf }
 0xea9   :  { %1933 = vmax.xlane.f32.xlu0 %v1932_v6  ;;  %v1622_v6 = vld [vmem:[%s4356_s12 + $0x10] sm:$0xff] }
 0xeb8   :  { %1958 = vrot.lane.b32.xlu1 %v4067_v39, %s3687_s5 }
 0xebc   :  { %1956 = vrot.lane.b32.xlu1 %v4071_v18, %s3687_s5 }
 0xec0   :  { %1954 = vrot.lane.b32.xlu1 %v4077_v19, %s3687_s5 }
 0xec4   :  { %2217 = vrot.lane.b32.xlu1 %v4067_v39, %s3691_s1 }
 0xec8   :  { %2213 = vrot.lane.b32.xlu1 %v4077_v19, %s3691_s1 }
 0xecc   :  { %2211 = vrot.lane.b32.xlu1 %v4092_v24, %s3691_s1 }
 0xf30   :  { %v1937_v7 = vpop.xlane.xlu1 %1936 }
 0xf31   :  { %v1939_v8 = vsub.f32 %v1929_v3, %v1937_v7 }
 0xf32   :  { %v1934_v9 = vpop.xlane.xlu0 %1933 }
 0xf33   :  { %v1942_v11 = vmul.f32 1.442695, %v1939_v8  ;;  %v1938_v13 = vsub.f32 %v1924_v5, %v1934_v9 }
 0xf34   :  { %v1959_v22 = vpop.permute.xlu1 %1958 }
 0xf35   :  { %3629 = vpow2.f32 %v1942_v11  ;;  %v1940_v37 = vmul.f32 1.442695, %v1938_v13 }
 0xf37   :  { %3631 = vpow2.f32 %v1940_v37 }
 0xf38   :  { %v1957_v27 = vpop.permute.xlu1 %1956 }
 0xf3c   :  { %v1955_v28 = vpop.permute.xlu1 %1954 }
 0xf40   :  { %v2218_v41 = vpop.permute.xlu1 %2217 }
 0xf42   :  { %v3630_v14 = vpop.eup %3629 }
 0xf43   :  { %v1947_v15 = vsel %vm74_vm0, %v3630_v14, 0.0 }
 0xf44   :  { %v3632_v17 = vpop.eup %3631  ;;  %1948 = vadd.xlane.f32.xlu0 %v1947_v15  ;;  %v2214_v42 = vpop.permute.xlu1 %2213 }
 0xf45   :  { %v1944_v20 = vsel %vm74_vm0, %v3632_v17, 0.0 }
 0xf48   :  { %1945 = vadd.xlane.f32.xlu0 %v1944_v20  ;;  %v2212_v43 = vpop.permute.xlu1 %2211 }
 0xf57   :  { %v3474_v13 = vpop.f32.mrf.mxu1 }
 0xf59   :  { %v2200_v37 = vpop.f32.mrf.mxu1 }
 0xf5e   :  { %1960 = vrot.lane.b32.xlu0 %v4063_v16, %s3687_s5 }
 0xf62   :  { %2219 = vrot.lane.b32.xlu0 %v4063_v16, %s3691_s1 }
 0xf66   :  { %2215 = vrot.lane.b32.xlu0 %v4071_v18, %s3691_s1 }
 0xf6a   :  { %2209 = vrot.lane.b32.xlu0 %v4090_v23, %s3691_s1 }
 0xfcd   :  { %v1949_v21 = vpop.xlane.xlu0 %1948 }
 0xfce   :  { %3633 = vrcp.f32 %v1949_v21 }
 0xfd1   :  { %v1946_v26 = vpop.xlane.xlu0 %1945 }
 0xfd2   :  { %3635 = vrcp.f32 %v1946_v26 }
 0xfd5   :  { %v1961_v0 = vpop.permute.xlu0 %1960 }
 0xfd6   :  { %3454 = vmatprep.subr.mxu0 %v1961_v0 }
 0xfd7   :  { %3455 = vmatpush3.msra.mxu0 %v1961_v0 }
 0xfd8   :  { %3456 = vmatprep.subr.mxu0 %v1959_v22 }
 0xfd9   :  { %3457 = vmatpush3.msra.mxu0 %v1959_v22  ;;  %v2220_v34 = vpop.permute.xlu0 %2219 }
 0xfda   :  { %3458 = vmatprep.subr.mxu0 %v1957_v27 }
 0xfdb   :  { %3459 = vmatpush3.msra.mxu0 %v1957_v27  ;;  %v3634_v30 = vpop.eup %3633 }
 0xfdc   :  { %3460 = vmatprep.subr.mxu0 %v1955_v28  ;;  %v1953_v62 = vmul.f32 %v3634_v30, %v3630_v14 }
 0xfdd   :  { %3461 = vmatpush3.msra.mxu0 %v1955_v28  ;;  %v2216_v35 = vpop.permute.xlu0 %2215 }
 0xfde   :  { %3465 = vmatprep.subr.mxu0 %v1621_v29 }
 0xfdf   :  { %v3636_v31 = vpop.eup %3635 }
 0xfe0   :  { %v1952_v33 = vmul.f32 %v3636_v31, %v3632_v17 }
 0xfe1   :  { %v2210_v40 = vpop.permute.xlu0 %2209 }
 0xfe2   :  { %3462 = vmatprep.mubr.msk.f32.mxu0 %vm74_vm0, %v1952_v33 }
 0xfe3   :  { %3463 = vmatmul.mubr.msk.f32.vlgmr.msra.gmra.mxu0 %vm74_vm0, %v1953_v62 }
 0xfe4   :  { %3466 = vmatpush3.msra.mxu0 %v1621_v29 }
 0xfe5   :  { %3475 = vmatprep.subr.msk.mxu0 %vm234_vm5, %v2220_v34 }
0x10a3   :  { %v3464_v36 = vpop.f32.mrf.mxu0 }
0x10a5   :  { %v2038_v38 = vpop.f32.mrf.mxu0 }
0x10a6   :  { %3467 = vmatprep.mubr.msk.f32.mxu0 %vm234_vm5, %v2038_v38 }
0x10a7   :  { %3468 = vmatmul.mubr.msk.f32.vlgmr.msra.gmra.mxu0 %vm234_vm5, %v3464_v36 }
0x10a8   :  { %3476 = vmatpush3.xpose.msk.msra.mxu0 %vm234_vm5, %v2220_v34  ;;  %3483 = vmatprep.mubr.msk.f32.mxu0 %vm234_vm5, %v2210_v40 }
0x10a9   :  { %3477 = vmatprep.subr.msk.mxu0 %vm234_vm5, %v2218_v41 }
0x10ac   :  { %3478 = vmatpush3.xpose.msk.msra.mxu0 %vm234_vm5, %v2218_v41 }
0x10ad   :  { %3479 = vmatprep.subr.msk.mxu0 %vm234_vm5, %v2216_v35 }
0x10b0   :  { %3480 = vmatpush3.xpose.msk.msra.mxu0 %vm234_vm5, %v2216_v35 }
0x10b1   :  { %3481 = vmatprep.subr.msk.mxu0 %vm234_vm5, %v2214_v42 }
0x10b4   :  { %3482 = vmatpush3.xpose.msk.msra.mxu0 %vm234_vm5, %v2214_v42 }
0x10b7   :  { %3484 = vmatmul.mubr.msk.f32.vlgmr.msra.gmra.mxu0 %vm234_vm5, %v2212_v43 }
0x1167   :  { %v4194_v44 = vpop.f32.mrf.mxu0 }
0x1168   :  { %v2206_v27 = vadd.f32 %v3474_v13, %v4194_v44 }
0x1169   :  { %v4196_v45 = vpop.f32.mrf.mxu0 }
0x116a   :  { %v2201_v28 = vadd.f32 %v2200_v37, %v4196_v45 }
0x1177   :  { %v3485_v60 = vpop.f32.mrf.mxu0 }
0x1178   :  { %v2305_v46 = vadd.f32 %v3485_v60, %v4101_v25 }
0x1179   :  { %v2299_v47 = vpop.f32.mrf.mxu0 }
0x117a   :  { %v2300_v48 = vadd.f32 %v2299_v47, %v4106_v1  ;;  %v2311_v49 = vsel %vm74_vm0, %v2305_v46, -inf }
0x117b   :  { %2312 = vmax.xlane.f32.xlu1 %v2311_v49 }
0x117c   :  { %v2308_v51 = vsel %vm74_vm0, %v2300_v48, -inf }
0x117d   :  { %2309 = vmax.xlane.f32.xlu0 %v2308_v51  ;;  %v1623_v51 = vld [vmem:[%s4356_s12 + $0x18] sm:$0xff] }
0x118c   :  { %2334 = vrot.lane.b32.xlu1 %v4067_v39, %s3690_s21 }
0x1190   :  { %2332 = vrot.lane.b32.xlu1 %v4071_v18, %s3690_s21 }
0x1194   :  { %2330 = vrot.lane.b32.xlu1 %v4077_v19, %s3690_s21 }
0x1198   :  { %2514 = vrot.lane.b32.xlu1 %v4067_v39, %s3693_s23 }
0x119c   :  { %2510 = vrot.lane.b32.xlu1 %v4077_v19, %s3693_s23 }
0x11a0   :  { %2508 = vrot.lane.b32.xlu1 %v4092_v24, %s3693_s23 }
0x1204   :  { %v2313_v50 = vpop.xlane.xlu1 %2312 }
0x1205   :  { %v2315_v52 = vsub.f32 %v2305_v46, %v2313_v50 }
0x1206   :  { %v2310_v54 = vpop.xlane.xlu0 %2309 }
0x1207   :  { %v2318_v55 = vmul.f32 1.442695, %v2315_v52  ;;  %v2314_v56 = vsub.f32 %v2300_v48, %v2310_v54 }
0x1208   :  { %v2335_v2 = vpop.permute.xlu1 %2334 }
0x1209   :  { %3637 = vpow2.f32 %v2318_v55  ;;  %v2316_v57 = vmul.f32 1.442695, %v2314_v56 }
0x120b   :  { %3639 = vpow2.f32 %v2316_v57  ;;  %v3162_v57 = vld [vmem:[%s4357_s13] ss:$0 sm:$0xff] }
0x120c   :  { %v2333_v4 = vpop.permute.xlu1 %2332 }
0x1210   :  { %v2331_v53 = vpop.permute.xlu1 %2330 }
0x1214   :  { %v2515_v21 = vpop.permute.xlu1 %2514 }
0x1216   :  { %v3638_v58 = vpop.eup %3637 }
0x1217   :  { %v2323_v59 = vsel %vm74_vm0, %v3638_v58, 0.0 }
0x1218   :  { %v3640_v61 = vpop.eup %3639  ;;  %2324 = vadd.xlane.f32.xlu0 %v2323_v59  ;;  %v2511_v22 = vpop.permute.xlu1 %2510 }
0x1219   :  { %v2320_v63 = vsel %vm74_vm0, %v3640_v61, 0.0 }
0x121c   :  { %2321 = vadd.xlane.f32.xlu0 %v2320_v63  ;;  %v2509_v26 = vpop.permute.xlu1 %2508 }
0x1232   :  { %2336 = vrot.lane.b32.xlu0 %v4063_v16, %s3690_s21 }
0x1236   :  { %2516 = vrot.lane.b32.xlu0 %v4063_v16, %s3693_s23 }
0x123a   :  { %2512 = vrot.lane.b32.xlu0 %v4071_v18, %s3693_s23 }
0x123e   :  { %2506 = vrot.lane.b32.xlu0 %v4090_v23, %s3693_s23 }
0x12a1   :  { %v2325_v24 = vpop.xlane.xlu0 %2324 }
0x12a2   :  { %3641 = vrcp.f32 %v2325_v24 }
0x12a5   :  { %v2322_v3 = vpop.xlane.xlu0 %2321 }
0x12a6   :  { %3643 = vrcp.f32 %v2322_v3 }
0x12a9   :  { %v2337_v5 = vpop.permute.xlu0 %2336 }
0x12aa   :  { %3486 = vmatprep.subr.mxu1 %v2337_v5 }
0x12ab   :  { %3487 = vmatpush3.msra.mxu1 %v2337_v5 }
0x12ac   :  { %3488 = vmatprep.subr.mxu1 %v2335_v2 }
0x12ad   :  { %3489 = vmatpush3.msra.mxu1 %v2335_v2  ;;  %v2517_v11 = vpop.permute.xlu0 %2516 }
0x12ae   :  { %3490 = vmatprep.subr.mxu1 %v2333_v4 }
0x12af   :  { %3491 = vmatpush3.msra.mxu1 %v2333_v4  ;;  %v3642_v23 = vpop.eup %3641 }
0x12b0   :  { %3492 = vmatprep.subr.mxu1 %v2331_v53  ;;  %v2329_v9 = vmul.f32 %v3642_v23, %v3638_v58 }
0x12b1   :  { %3493 = vmatpush3.msra.mxu1 %v2331_v53  ;;  %v2513_v14 = vpop.permute.xlu0 %2512 }
0x12b2   :  { %3497 = vmatprep.subr.mxu1 %v1622_v6 }
0x12b3   :  { %v3644_v7 = vpop.eup %3643 }
0x12b4   :  { %v2328_v8 = vmul.f32 %v3644_v7, %v3640_v61 }
0x12b5   :  { %v2507_v20 = vpop.permute.xlu0 %2506 }
0x12b6   :  { %3494 = vmatprep.mubr.msk.f32.mxu1 %vm74_vm0, %v2328_v8 }
0x12b7   :  { %3495 = vmatmul.mubr.msk.f32.vlgmr.msra.gmra.mxu1 %vm74_vm0, %v2329_v9 }
0x12b8   :  { %3498 = vmatpush3.msra.mxu1 %v1622_v6 }
0x12b9   :  { %3502 = vmatprep.subr.msk.mxu1 %vm234_vm5, %v2517_v11 }
0x1377   :  { %v3496_v15 = vpop.f32.mrf.mxu1 }
0x1379   :  { %v2414_v17 = vpop.f32.mrf.mxu1 }
0x137a   :  { %3499 = vmatprep.mubr.msk.f32.mxu1 %vm234_vm5, %v2414_v17  ;;  %v2866_v17 = vld [vmem:[%s4358_s14 + $0x8] sm:$0xff] }
0x137b   :  { %3500 = vmatmul.mubr.msk.f32.vlgmr.msra.gmra.mxu1 %vm234_vm5, %v3496_v15  ;;  %v2867_v15 = vld [vmem:[%s4358_s14 + $0x10] sm:$0xff] }
0x137c   :  { %3503 = vmatpush3.xpose.msk.msra.mxu1 %vm234_vm5, %v2517_v11  ;;  %3510 = vmatprep.mubr.msk.f32.mxu1 %vm234_vm5, %v2507_v20  ;;  %v2865_v20 = vld [vmem:[%s4358_s14] sm:$0xff] }
0x137d   :  { %3504 = vmatprep.subr.msk.mxu1 %vm234_vm5, %v2515_v21 }
0x1380   :  { %3505 = vmatpush3.xpose.msk.msra.mxu1 %vm234_vm5, %v2515_v21  ;;  %v2966_v21 = vld [vmem:[%s4360_s16 + $0x38] sm:$0xff] }
0x1381   :  { %3506 = vmatprep.subr.msk.mxu1 %vm234_vm5, %v2513_v14 }
0x1384   :  { %3507 = vmatpush3.xpose.msk.msra.mxu1 %vm234_vm5, %v2513_v14  ;;  %v2868_v14 = vld [vmem:[%s4358_s14 + $0x18] sm:$0xff] }
0x1385   :  { %3508 = vmatprep.subr.msk.mxu1 %vm234_vm5, %v2511_v22 }
0x1388   :  { %3509 = vmatpush3.xpose.msk.msra.mxu1 %vm234_vm5, %v2511_v22  ;;  %v2965_v22 = vld [vmem:[%s4360_s16 + $0x30] sm:$0xff] }
0x1389   :  { %3540 = vmatprep.subr.mxu1 %v2966_v21 }
0x138b   :  { %3511 = vmatmul.mubr.msk.f32.vlgmr.msra.gmra.mxu1 %vm234_vm5, %v2509_v26  ;;  %v2964_v26 = vld [vmem:[%s4360_s16 + $0x28] sm:$0xff] }
0x138c   :  { %3541 = vmatpush3.msra.mxu1 %v2966_v21 }
0x138d   :  { %3542 = vmatprep.subr.mxu1 %v2965_v22 }
0x138e   :  { %3543 = vmatpush3.msra.mxu1 %v2965_v22 }
0x138f   :  { %3544 = vmatprep.subr.mxu1 %v2964_v26 }
0x1390   :  { %3545 = vmatpush3.msra.mxu1 %v2964_v26 }
0x143b   :  { %v3501_v0 = vpop.f32.mrf.mxu1 }
0x143c   :  { %v2505_v29 = vadd.f32 %v3501_v0, %v2206_v27  ;;  %v2963_v27 = vld [vmem:[%s4360_s16 + $0x20] sm:$0xff] }
0x143d   :  { %v2495_v30 = vpop.f32.mrf.mxu1  ;;  %3546 = vmatprep.subr.mxu1 %v2963_v27 }
0x143e   :  { %v2504_v31 = vadd.f32 %v2495_v30, %v2201_v28  ;;  %3547 = vmatpush3.msra.mxu1 %v2963_v27 }
0x144b   :  { %v3512_v33 = vpop.f32.mrf.mxu1 }
0x144c   :  { %v2602_v62 = vadd.f32 %v3512_v33, %v4101_v25 }
0x144d   :  { %v2596_v34 = vpop.f32.mrf.mxu1 }
0x144e   :  { %v2597_v35 = vadd.f32 %v2596_v34, %v4106_v1  ;;  %v2608_v36 = vsel %vm74_vm0, %v2602_v62, -inf }
0x144f   :  { %2609 = vmax.xlane.f32.xlu1 %v2608_v36 }
0x1450   :  { %v2605_v38 = vsel %vm74_vm0, %v2597_v35, -inf }
0x1451   :  { %2606 = vmax.xlane.f32.xlu0 %v2605_v38 }
0x1460   :  { %2631 = vrot.lane.b32.xlu1 %v4067_v39, %s3692_s22 }
0x1464   :  { %2629 = vrot.lane.b32.xlu1 %v4071_v18, %s3692_s22 }
0x1468   :  { %2627 = vrot.lane.b32.xlu1 %v4077_v19, %s3692_s22 }
0x14d8   :  { %v2610_v40 = vpop.xlane.xlu1 %2609 }
0x14d9   :  { %v2612_v25 = vsub.f32 %v2602_v62, %v2610_v40 }
0x14da   :  { %v2607_v41 = vpop.xlane.xlu0 %2606 }
0x14db   :  { %v2615_v42 = vmul.f32 1.442695, %v2612_v25  ;;  %v2611_v1 = vsub.f32 %v2597_v35, %v2607_v41 }
0x14dc   :  { %v2632_v19 = vpop.permute.xlu1 %2631 }
0x14dd   :  { %3645 = vpow2.f32 %v2615_v42  ;;  %v2613_v43 = vmul.f32 1.442695, %v2611_v1 }
0x14df   :  { %3647 = vpow2.f32 %v2613_v43  ;;  %v2835_v43 = vsub.s32 2, %v3834_v32 }
0x14e0   :  { %v2630_v47 = vpop.permute.xlu1 %2629 }
0x14e4   :  { %v2628_v49 = vpop.permute.xlu1 %2627 }
0x14ea   :  { %v3646_v44 = vpop.eup %3645 }
0x14eb   :  { %v2620_v45 = vsel %vm74_vm0, %v3646_v44, 0.0 }
0x14ec   :  { %v3648_v60 = vpop.eup %3647  ;;  %2621 = vadd.xlane.f32.xlu0 %v2620_v45 }
0x14ed   :  { %v2617_v39 = vsel %vm74_vm0, %v3648_v60, 0.0 }
0x14f0   :  { %2618 = vadd.xlane.f32.xlu0 %v2617_v39  ;;  %v3662_v39 = vld [vmem:[%s4363_s19] sm:$0x7] }
0x1506   :  { %2633 = vrot.lane.b32.xlu0 %v4063_v16, %s3692_s22 }
0x1575   :  { %v2622_v18 = vpop.xlane.xlu0 %2621 }
0x1576   :  { %3649 = vrcp.f32 %v2622_v18  ;;  %v2862_v18 = vrot.slane %v3662_v39, %v2835_v43 }
0x1579   :  { %v2619_v46 = vpop.xlane.xlu0 %2618 }
0x157a   :  { %3651 = vrcp.f32 %v2619_v46 }
0x157d   :  { %v2634_v48 = vpop.permute.xlu0 %2633 }
0x157e   :  { %3513 = vmatprep.subr.mxu0 %v2634_v48 }
0x157f   :  { %3514 = vmatpush3.msra.mxu0 %v2634_v48 }
0x1580   :  { %3515 = vmatprep.subr.mxu0 %v2632_v19 }
0x1581   :  { %3516 = vmatpush3.msra.mxu0 %v2632_v19 }
0x1582   :  { %3517 = vmatprep.subr.mxu0 %v2630_v47 }
0x1583   :  { %3518 = vmatpush3.msra.mxu0 %v2630_v47  ;;  %v3650_v16 = vpop.eup %3649 }
0x1584   :  { %3519 = vmatprep.subr.mxu0 %v2628_v49  ;;  %v2626_v54 = vmul.f32 %v3650_v16, %v3646_v44  ;;  %v3661_v44 = vld [vmem:[%s4362_s18] sm:$0x7]  ;;  %v2962_v16 = vld [vmem:[%s4360_s16 + $0x18] sm:$0xff] }
0x1585   :  { %3520 = vmatpush3.msra.mxu0 %v2628_v49  ;;  %v2836_v45 = vrot.slane %v3661_v44, %v2835_v43  ;;  %3548 = vmatprep.subr.mxu1 %v2962_v16 }
0x1586   :  { %3524 = vmatprep.subr.mxu0 %v1623_v51  ;;  %3549 = vmatpush3.msra.mxu1 %v2962_v16 }
0x1587   :  { %v3652_v50 = vpop.eup %3651 }
0x1588   :  { %v2625_v52 = vmul.f32 %v3652_v50, %v3648_v60  ;;  %v2961_v50 = vld [vmem:[%s4360_s16 + $0x10] sm:$0xff] }
0x1589   :  { %3550 = vmatprep.subr.mxu1 %v2961_v50 }
0x158a   :  { %3521 = vmatprep.mubr.msk.f32.mxu0 %vm74_vm0, %v2625_v52  ;;  %3551 = vmatpush3.msra.mxu1 %v2961_v50  ;;  %v2960_v52 = vld [vmem:[%s4360_s16 + $0x8] sm:$0xff] }
0x158b   :  { %3522 = vmatmul.mubr.msk.f32.vlgmr.msra.gmra.mxu0 %vm74_vm0, %v2626_v54  ;;  %3552 = vmatprep.subr.mxu1 %v2960_v52  ;;  %v2959_v54 = vld [vmem:[%s4360_s16] sm:$0xff]  ;;  %s3696_s16 = smov [#allocation2]  }
0x158c   :  { %3525 = vmatpush3.msra.mxu0 %v1623_v51  ;;  %3553 = vmatpush3.msra.mxu1 %v2960_v52  ;;  %s3067_s8 = sshll.u32 %s3696_s16, 4  ;;  %s3068_s8 = int_to_ptr.vmem [resolvable:$true] %s3067_s8 }
0x158d   :  { %3529 = vmatprep.subr.mxu0 %v2868_v14  ;;  %3554 = vmatprep.subr.mxu1 %v2959_v54  ;;  %p3668_p1 = scmp.lt.s32.totalorder %s3068_s8, %s3068_s8 }
0x158e   :  { %3555 = vmatpush3.msra.mxu1 %v2959_v54 }
0x164b   :  { %v3523_v55 = vpop.f32.mrf.mxu0 }
0x164d   :  { %v2711_v56 = vpop.f32.mrf.mxu0 }
0x164e   :  { %3526 = vmatprep.mubr.msk.f32.mxu0 %vm234_vm5, %v2711_v56 }
0x164f   :  { %3527 = vmatmul.mubr.msk.f32.vlgmr.msra.gmra.mxu0 %vm234_vm5, %v3523_v55  ;;  %v3163_v55 = vld [vmem:[%s4359_s15] ss:$0 sm:$0xff]  ;;  %s3663_s15 = scalar_lea.vmem %s3068_s8, 256 }
0x1650   :  { %3530 = vmatpush3.msra.mxu0 %v2868_v14  ;;  %p3664_p0 = scmp.ne.s32.totalorder %s3068_s8, %s3663_s15  ;;  %p3669_p2 = scmp.lt.s32.totalorder %s3663_s15, %s3663_s15 }
0x1651   :  { %3531 = vmatprep.subr.mxu0 %v2867_v15 }
0x1652   :  { %3532 = vmatpush3.msra.mxu0 %v2867_v15  ;;  %p3670_p3 = por %p3669_p2, %p3668_p1 }
0x1653   :  { %3533 = vmatprep.subr.mxu0 %v2866_v17 }
0x1654   :  { %3534 = vmatpush3.msra.mxu0 %v2866_v17  ;;  %p3671_p4 = pnand %p3670_p3, %p3664_p0 }
0x1655   :  { %3535 = vmatprep.subr.mxu0 %v2865_v20 }
0x1656   :  { %3536 = vmatpush3.msra.mxu0 %v2865_v20 }
0x170f   :  { %v3528_v58 = vpop.f32.mrf.mxu0 }
0x1710   :  { %v2802_v59 = vadd.f32 %v3528_v58, %v2505_v29 }
0x1711   :  { %v2792_v61 = vpop.f32.mrf.mxu0 }
0x1712   :  { %v2810_v63 = vadd.f32 %v3162_v57, %v2802_v59  ;;  %v2801_v24 = vadd.f32 %v2792_v61, %v2504_v31 }
0x1714   :  { %v4268_v2 = vadd.f32 %v2810_v63, %v3992_v10  ;;  %v2809_v3 = vadd.f32 %v3162_v57, %v2801_v24 }
0x1716   :  { %v4271_v4 = vadd.f32 %v2809_v3, %v3995_v12  ;;  %v2816_v5 = vsel %vm74_vm0, %v4268_v2, 0.0  ;;  %v3168_v3 = vld [vmem:[%s4361_s17] ss:$0 sm:$0xff] }
0x1717   :  { %2817 = vadd.xlane.f32.xlu1 %v2816_v5 }
0x1718   :  { %v2813_v53 = vsel %vm74_vm0, %v4271_v4, 0.0 }
0x1719   :  { %2814 = vadd.xlane.f32.xlu0 %v2813_v53 }
0x17a0   :  { %v2818_v6 = vpop.xlane.xlu1 %2817 }
0x17a1   :  { %v2820_v23 = vmul.f32 0.03125, %v2818_v6 }
0x17a2   :  { %v2815_v7 = vpop.xlane.xlu0 %2814 }
0x17a3   :  { %v2819_v8 = vmul.f32 0.03125, %v2815_v7  ;;  %v4278_v9 = vsub.f32 %v4268_v2, %v2820_v23 }
0x17a5   :  { %v2821_v10 = vsub.f32 %v4271_v4, %v2819_v8  ;;  %v2824_v13 = vmul.f32 %v4278_v9, %v4278_v9  ;;  %v2838_v47 = vmul.f32 %v2836_v45, %v4278_v9 }
0x17a7   :  { %v2823_v11 = vmul.f32 %v2821_v10, %v2821_v10  ;;  %v2828_v37 = vsel %vm74_vm0, %v2824_v13, 0.0  ;;  %v2837_v60 = vmul.f32 %v2836_v45, %v2821_v10 }
0x17a9   :  { %v2825_v12 = vsel %vm74_vm0, %v2823_v11, 0.0 }
0x17aa   :  { %2826 = vadd.xlane.f32.xlu0 %v2825_v12 }
0x17ae   :  { %2829 = vadd.xlane.f32.xlu0 %v2828_v37 }
0x1833   :  { %v2827_v0 = vpop.xlane.xlu0 %2826 }
0x1834   :  { %v2831_v28 = vmul.f32 0.032258064, %v2827_v0 }
0x1836   :  { %3653 = vrsqrt.f32 %v2831_v28  ;;  %vm2841_vm11 = vcmp.eq.f32.partialorder %v2831_v28, inf  ;;  %v2844_v62 = vand.u32 2147483648, %v2831_v28  ;;  %vm2843_vm12 = vcmp.eq.f32.partialorder %v2831_v28, 0.0 }
0x1837   :  { %v2830_v29 = vpop.xlane.xlu0 %2829 }
0x1838   :  { %v2832_v30 = vmul.f32 0.032258064, %v2830_v29 }
0x183a   :  { %3655 = vrsqrt.f32 %v2832_v30  ;;  %vm2848_vm13 = vcmp.eq.f32.partialorder %v2832_v30, inf  ;;  %v2851_v25 = vand.u32 2147483648, %v2832_v30  ;;  %vm2850_vm14 = vcmp.eq.f32.partialorder %v2832_v30, 0.0 }
0x1843   :  { %v3654_v31 = vpop.eup %3653 }
0x1844   :  { %v2840_v33 = vmul.f32 %v3654_v31, %v2831_v28 }
0x1846   :  { %v2842_v34 = vsel %vm2841_vm11, %v2831_v28, %v2840_v33 }
0x1847   :  { %v3656_v35 = vpop.eup %3655  ;;  %v2845_v36 = vsel %vm2843_vm12, %v2844_v62, %v2842_v34 }
0x1848   :  { %v2853_v38 = vadd.f32 1e-06, %v2845_v36  ;;  %v2847_v40 = vmul.f32 %v3656_v35, %v2832_v30 }
0x184a   :  { %3657 = vrcp.f32 %v2853_v38  ;;  %v2849_v41 = vsel %vm2848_vm13, %v2832_v30, %v2847_v40 }
0x184b   :  { %v2852_v42 = vsel %vm2850_vm14, %v2851_v25, %v2849_v41 }
0x184c   :  { %v2854_v1 = vadd.f32 1e-06, %v2852_v42 }
0x184e   :  { %3659 = vrcp.f32 %v2854_v1 }
0x1857   :  { %v3658_v19 = vpop.eup %3657 }
0x1858   :  { %v2856_v46 = vmul.f32 %v3658_v19, %v2837_v60 }
0x185a   :  { %v2863_v48 = vadd.f32 %v2862_v18, %v2856_v46 }
0x185b   :  { %v3660_v49 = vpop.eup %3659 }
0x185c   :  { %v2858_v51 = vmul.f32 %v3660_v49, %v2838_v47  ;;  %3537 = vmatprep.mubr.msk.f32.mxu0 %vm74_vm0, %v2863_v48 }
0x185e   :  { %v2864_v32 = vadd.f32 %v2862_v18, %v2858_v51 }
0x1860   :  { %3538 = vmatmul.mubr.msk.f32.vlgmr.msra.gmra.mxu0 %vm74_vm0, %v2864_v32 }
0x1920   :  { %v3539_v56 = vpop.f32.mrf.mxu0 }
0x1921   :  { %v2954_v57 = vadd.f32 %v3539_v56, %v3163_v55 }
0x1922   :  { %v2948_v58 = vpop.f32.mrf.mxu0 }
0x1923   :  { %v2949_v59 = vadd.f32 %v3163_v55, %v2948_v58  ;;  %v2958_v63 = vmax.f32 %v2954_v57, 0.0 }
0x1925   :  { %v2957_v61 = vmax.f32 %v2949_v59, 0.0 }
0x1927   :  { %3556 = vmatprep.mubr.msk.f32.mxu1 %vm2967_vm15, %v2957_v61 }
0x1928   :  { %3557 = vmatmul.mubr.msk.f32.vlgmr.msra.gmra.mxu1 %vm2967_vm15, %v2958_v63 }
0x19e8   :  { %v3558_v24 = vpop.f32.mrf.mxu1 }
0x19e9   :  { %v3050_v5 = vadd.f32 %v3558_v24, %v4268_v2 }
0x19ea   :  { %v3040_v53 = vpop.f32.mrf.mxu1 }
0x19eb   :  { %v3059_v6 = vadd.f32 %v3168_v3, %v3050_v5  ;;  %v3049_v23 = vadd.f32 %v3040_v53, %v4271_v4 }
0x19ed   :  { %3061 = vst.msk [vmem:[#allocation2 + $0x8] sm:$0xff] %vm74_vm0, %v3059_v6  ;;  %v3058_v7 = vadd.f32 %v3168_v3, %v3049_v23 }
0x19ef   :  { %3060 = vst.msk [vmem:[#allocation2] sm:$0xff] %vm74_vm0, %v3058_v7 }
0x19f0   :  { %3674 = shalt.err (!%p3671_p4)
}
0x19f1   :  { %s3697_s17 = smov 128   ;;  %s3698_s27 = smov 8  }
0x19f2   :  { %3073 = dma.vmem_to_hbm [thread:$0]  %s3068_s8, 256, %s4364_s20, [#allocation3], %s3697_s17, %s3697_s17, %s3698_s27  }
0x19f3   :  { %3683 = dma.done.wait [#allocation3], 256  }
0x19f4   :  { %3684 = vsyncadd [#allocation3], 4294967040 }
0x19f5   :  { %3077 = vsyncpa [#allocation3], 1 }

</bundles_post_ra>
